<compile_context>
chip_gen: v5e
topology: v5e:2x2
jax: 0.10.0
libtpu: 0.0.40
codegen_flags: <defaults>
</compile_context>

<pallas_src>
import functools
import math

import numpy as np
import jax
import jax.numpy as jnp
from jax import lax
from jax.experimental import pallas as pl
from jax.experimental.pallas import tpu as pltpu

_HP = lax.Precision.HIGHEST
_VMEM_LIMIT = 32 * 1024 * 1024


# ---------------------------------------------------------------------------
# Host-side filter construction (numpy) — faithful to get_filter('legendre', k)
# ---------------------------------------------------------------------------
def _legendre_filters(k):
    Poly = np.polynomial.Polynomial

    phi_coeff = np.zeros((k, k))
    phi_2x_coeff = np.zeros((k, k))
    for ki in range(k):
        leg = np.zeros(ki + 1)
        leg[ki] = 1.0
        mono = np.polynomial.legendre.leg2poly(leg)       # P_ki(x), ascending
        P = Poly(mono)
        c1 = P(Poly([-1.0, 2.0])).coef                    # P_ki(2x - 1)
        c2 = P(Poly([-1.0, 4.0])).coef                    # P_ki(4x - 1)
        phi_coeff[ki, : len(c1)] = np.sqrt(2 * ki + 1) * c1
        phi_2x_coeff[ki, : len(c2)] = np.sqrt(2) * np.sqrt(2 * ki + 1) * c2

    def _inner(a, b, weight_fn):
        prod_ = np.convolve(a, b)
        prod_[np.abs(prod_) < 1e-8] = 0
        n = np.arange(len(prod_))
        return (prod_ * (1.0 / (n + 1)) * weight_fn(n)).sum()

    w_lo = lambda n: np.power(0.5, 1 + n)        # integral of x^n over [0, 1/2]
    w_hi = lambda n: 1 - np.power(0.5, 1 + n)    # integral of x^n over [1/2, 1]

    psi1_coeff = np.zeros((k, k))
    psi2_coeff = np.zeros((k, k))
    for ki in range(k):
        psi1_coeff[ki, :] = phi_2x_coeff[ki, :]
        for i in range(k):
            proj_ = _inner(phi_2x_coeff[ki, : ki + 1], phi_coeff[i, : i + 1], w_lo)
            psi1_coeff[ki, :] -= proj_ * phi_coeff[i, :]
            psi2_coeff[ki, :] -= proj_ * phi_coeff[i, :]
        for j in range(ki):
            proj_ = _inner(phi_2x_coeff[ki, : ki + 1], psi1_coeff[j, :], w_lo)
            psi1_coeff[ki, :] -= proj_ * psi1_coeff[j, :]
            psi2_coeff[ki, :] -= proj_ * psi2_coeff[j, :]
        norm1 = _inner(psi1_coeff[ki, :], psi1_coeff[ki, :], w_lo)
        norm2 = _inner(psi2_coeff[ki, :], psi2_coeff[ki, :], w_hi)
        norm_ = np.sqrt(norm1 + norm2)
        psi1_coeff[ki, :] /= norm_
        psi2_coeff[ki, :] /= norm_
        psi1_coeff[np.abs(psi1_coeff) < 1e-8] = 0
        psi2_coeff[np.abs(psi2_coeff) < 1e-8] = 0

    phi = [np.poly1d(np.flip(phi_coeff[i, :])) for i in range(k)]
    psi1 = [np.poly1d(np.flip(psi1_coeff[i, :])) for i in range(k)]
    psi2 = [np.poly1d(np.flip(psi2_coeff[i, :])) for i in range(k)]

    def psi(i, x):
        mask = (x <= 0.5) * 1.0
        return psi1[i](x) * mask + psi2[i](x) * (1 - mask)

    # Gauss-Legendre quadrature on [0, 1] (same nodes/weights as the sympy path).
    y, w = np.polynomial.legendre.leggauss(k)
    x_m = (y + 1) / 2
    wm = w / 2

    H0 = np.zeros((k, k)); H1 = np.zeros((k, k))
    G0 = np.zeros((k, k)); G1 = np.zeros((k, k))
    for ki in range(k):
        for kpi in range(k):
            H0[ki, kpi] = 1 / np.sqrt(2) * (wm * phi[ki](x_m / 2) * phi[kpi](x_m)).sum()
            G0[ki, kpi] = 1 / np.sqrt(2) * (wm * psi(ki, x_m / 2) * phi[kpi](x_m)).sum()
            H1[ki, kpi] = 1 / np.sqrt(2) * (wm * phi[ki]((x_m + 1) / 2) * phi[kpi](x_m)).sum()
            G1[ki, kpi] = 1 / np.sqrt(2) * (wm * psi(ki, (x_m + 1) / 2) * phi[kpi](x_m)).sum()
    for M in (H0, H1, G0, G1):
        M[np.abs(M) < 1e-8] = 0

    PHI0 = np.eye(k); PHI1 = np.eye(k)
    H0r = H0 @ PHI0; G0r = G0 @ PHI0
    H1r = H1 @ PHI1; G1r = G1 @ PHI1
    for M in (H0r, H1r, G0r, G1r):
        M[np.abs(M) < 1e-8] = 0

    ec_s = np.concatenate((H0.T, H1.T), axis=0)   # (2k, k)
    ec_d = np.concatenate((G0.T, G1.T), axis=0)   # (2k, k)
    rc_e = np.concatenate((H0r, G0r), axis=0)     # (2k, k)
    rc_o = np.concatenate((H1r, G1r), axis=0)     # (2k, k)
    return ec_s, ec_d, rc_e, rc_o


# ---------------------------------------------------------------------------
# Pallas kernels
# ---------------------------------------------------------------------------
def _linear_single_k_kernel(x_ref, w_ref, b_ref, o_ref):
    # y = x @ w + b, written straight to the output block (no scratch, no pl.when).
    o_ref[0] = (jnp.dot(x_ref[0], w_ref[0],
                        preferred_element_type=jnp.float32, precision=_HP)
                + b_ref[0].astype(jnp.float32))


def _linear_multi_k_kernel(x_ref, w_ref, b_ref, o_ref):
    # Accumulate directly into the resident f32 output block; init with bias.
    @pl.when(pl.program_id(3) == 0)
    def _():
        o_ref[...] = jnp.broadcast_to(b_ref[...].astype(jnp.float32), o_ref.shape)

    o_ref[0] += jnp.dot(x_ref[0], w_ref[0],
                        preferred_element_type=jnp.float32, precision=_HP)


def _dual_filter_kernel(a_ref, b_ref, wa_ref, wb_ref, o_ref):
    # Lane-dense transposed filter matmul: out = Wa^T @ a + Wb^T @ b
    # (weights are passed pre-transposed: (Nout, Kin)); tokens live in lanes.
    o_ref[0] = (jnp.dot(wa_ref[...], a_ref[0],
                        preferred_element_type=jnp.float32, precision=_HP)
                + jnp.dot(wb_ref[...], b_ref[0],
                          preferred_element_type=jnp.float32, precision=_HP))


def _pad_axis(x, axis, multiple):
    size = x.shape[axis]
    pad = (-size) % multiple
    if pad == 0:
        return x
    widths = [(0, 0)] * x.ndim
    widths[axis] = (0, pad)
    return jnp.pad(x, widths)


def pallas_linear_batched(x, w, b=None, *, m_cap=256, n_cap=512, k_cap=512):
    """y[g] = x[g] @ w[g] + b[g];  x:(G,M,K) w:(G,K,N) b:(G,N) -> (G,M,N) f32."""
    G, M, K = x.shape
    N = w.shape[2]
    if b is None:
        b = jnp.zeros((G, N), jnp.float32)
    b3 = b.reshape(G, 1, N).astype(jnp.float32)
    x = x.astype(jnp.float32)
    w = w.astype(jnp.float32)

    # Full-extent blocks for small dims, fixed (aligned) tiles + wrapper padding
    # otherwise — never an oversized full-extent block.
    tm = M if M <= m_cap else m_cap
    tk = K if K <= k_cap else k_cap
    tn = N if N <= n_cap else n_cap
    if tm < M:
        x = _pad_axis(x, 1, tm)
    if tk < K:
        x = _pad_axis(x, 2, tk)
        w = _pad_axis(w, 1, tk)
    if tn < N:
        w = _pad_axis(w, 2, tn)
        b3 = _pad_axis(b3, 2, tn)
    Mp, Kp = x.shape[1], x.shape[2]
    Np = w.shape[2]

    if Kp // tk == 1:
        grid = (G, Mp // tm, Np // tn)
        kernel = _linear_single_k_kernel
        in_specs = [
            pl.BlockSpec((1, tm, tk), lambda g, i, j: (g, i, 0)),
            pl.BlockSpec((1, tk, tn), lambda g, i, j: (g, 0, j)),
            pl.BlockSpec((1, 1, tn), lambda g, i, j: (g, 0, j)),
        ]
        out_spec = pl.BlockSpec((1, tm, tn), lambda g, i, j: (g, i, j))
        semantics = ("parallel", "parallel", "parallel")
    else:
        grid = (G, Mp // tm, Np // tn, Kp // tk)
        kernel = _linear_multi_k_kernel
        in_specs = [
            pl.BlockSpec((1, tm, tk), lambda g, i, j, kk: (g, i, kk)),
            pl.BlockSpec((1, tk, tn), lambda g, i, j, kk: (g, kk, j)),
            pl.BlockSpec((1, 1, tn), lambda g, i, j, kk: (g, 0, j)),
        ]
        out_spec = pl.BlockSpec((1, tm, tn), lambda g, i, j, kk: (g, i, j))
        semantics = ("parallel", "parallel", "parallel", "arbitrary")

    out = pl.pallas_call(
        kernel,
        out_shape=jax.ShapeDtypeStruct((G, Mp, Np), jnp.float32),
        grid=grid,
        in_specs=in_specs,
        out_specs=out_spec,
        compiler_params=pltpu.CompilerParams(
            dimension_semantics=semantics,
            vmem_limit_bytes=_VMEM_LIMIT),
    )(x, w, b3)
    if Mp != M or Np != N:
        out = out[:, :M, :N]
    return out


def pallas_dual_filter(a, b, wa_t, wb_t, *, lane_cap=512):
    """out[g] = wa_t @ a[g] + wb_t @ b[g]
       a, b: (G, Kin, M);  wa_t, wb_t: (Nout, Kin)  ->  (G, Nout, M) f32."""
    G, Kin, M = a.shape
    Nout = wa_t.shape[0]
    a = a.astype(jnp.float32)
    b = b.astype(jnp.float32)
    wa_t = wa_t.astype(jnp.float32)
    wb_t = wb_t.astype(jnp.float32)

    tmm = M if M <= lane_cap else lane_cap
    if tmm < M:
        a = _pad_axis(a, 2, tmm)
        b = _pad_axis(b, 2, tmm)
    Mp = a.shape[2]

    out = pl.pallas_call(
        _dual_filter_kernel,
        out_shape=jax.ShapeDtypeStruct((G, Nout, Mp), jnp.float32),
        grid=(G, Mp // tmm),
        in_specs=[
            pl.BlockSpec((1, Kin, tmm), lambda g, j: (g, 0, j)),
            pl.BlockSpec((1, Kin, tmm), lambda g, j: (g, 0, j)),
            pl.BlockSpec((Nout, Kin), lambda g, j: (0, 0)),
            pl.BlockSpec((Nout, Kin), lambda g, j: (0, 0)),
        ],
        out_specs=pl.BlockSpec((1, Nout, tmm), lambda g, j: (g, 0, j)),
        compiler_params=pltpu.CompilerParams(
            dimension_semantics=("parallel", "parallel"),
            vmem_limit_bytes=_VMEM_LIMIT),
    )(a, b, wa_t, wb_t)
    if Mp != M:
        out = out[..., :M]
    return out


# ---------------------------------------------------------------------------
# FourierCrossAttentionW in the transposed (B, H=k, E=c, L) pipeline layout.
# TODO(synk): rfft/irfft + complex einsum/tanh have no Pallas TPU equivalent;
#             computed with jnp in the wrapper.
# ---------------------------------------------------------------------------
def fourier_cross_attention_t(qT, kT, vT, *, in_channels, out_channels, modes):
    Bq, H, E, Lq = qT.shape
    Lkv = vT.shape[-1]           # reference uses v only for its length
    mq = min(Lq // 2, modes)
    mkv = min(Lkv // 2, modes)
    if mq == 0 or mkv == 0:
        return jnp.zeros((Bq, H, E, Lq), jnp.float32)
    xq_ft = jnp.fft.rfft(qT, axis=-1)[..., :mq]
    xk_ft = jnp.fft.rfft(kT, axis=-1)[..., :mkv]
    xqk_ft = jnp.einsum('bhex,bhey->bhxy', xq_ft, xk_ft, precision=_HP)
    xqk_ft = jnp.tanh(xqk_ft)
    xqkv_ft = jnp.einsum('bhxy,bhey->bhex', xqk_ft, xk_ft, precision=_HP)
    out_ft = jnp.zeros((Bq, H, E, Lq // 2 + 1), xqkv_ft.dtype)
    out_ft = out_ft.at[..., :mq].set(xqkv_ft)
    out = jnp.fft.irfft(out_ft / in_channels / out_channels, n=Lq, axis=-1)
    return out.astype(jnp.float32)


# ---------------------------------------------------------------------------
# MultiWaveletCross forward (Pallas path, transposed lane-dense pipeline)
# ---------------------------------------------------------------------------
def multiwavelet_cross_forward(params, q, k, v, *, cfg):
    c, kw, L_lvl, modes = cfg['c'], cfg['k'], cfg['L'], cfg['modes']
    ic, oc = cfg['in_channels'], cfg['out_channels']

    B, N, H, E = q.shape
    _, S, _, _ = k.shape
    ich = H * E

    # ---- fused Q/K/V projection: one call, leading parallel axis of 3.
    P = max(N, S)

    def _pad_seq(x):
        if x.shape[1] == P:
            return x
        return jnp.pad(x, ((0, 0), (0, P - x.shape[1]), (0, 0)))

    qkv_in = jnp.stack([_pad_seq(q.reshape(B, N, ich)),
                        _pad_seq(k.reshape(B, S, ich)),
                        _pad_seq(v.reshape(B, S, ich))], axis=0)
    proj = pallas_linear_batched(qkv_in.reshape(3, B * P, ich),
                                 params['Lqkv_w'], params['Lqkv_b'])
    proj = proj.reshape(3, B, P, c, kw)
    qp, kp, vp = proj[0][:, :N], proj[1][:, :S], proj[2][:, :S]

    if N > S:
        z = jnp.zeros((B, N - S, c, kw), qp.dtype)
        kp = jnp.concatenate([kp, z], axis=1)
        vp = jnp.concatenate([vp, z], axis=1)
    else:
        kp = kp[:, :N]
        vp = vp[:, :N]

    ns = math.floor(math.log2(N))
    nl = 2 ** math.ceil(math.log2(N))
    ext = nl - N
    qp = jnp.concatenate([qp, qp[:, :ext]], axis=1)
    kp = jnp.concatenate([kp, kp[:, :ext]], axis=1)
    vp = jnp.concatenate([vp, vp[:, :ext]], axis=1)

    # ---- move to the transposed pipeline layout (B, k, c, L): tokens in lanes.
    x3 = jnp.concatenate([jnp.transpose(qp, (0, 3, 2, 1)),
                          jnp.transpose(kp, (0, 3, 2, 1)),
                          jnp.transpose(vp, (0, 3, 2, 1))], axis=0)   # (3B,k,c,nl)

    attn = functools.partial(fourier_cross_attention_t,
                             in_channels=ic, out_channels=oc, modes=modes)

    # ---- wavelet decomposition: one fused (q|k|v) lane-dense call per level.
    levels = []
    cur = x3
    for _ in range(ns - L_lvl):
        Lh = cur.shape[-1] // 2
        x_e = cur[..., 0::2].reshape(3 * B, kw, c * Lh)
        x_o = cur[..., 1::2].reshape(3 * B, kw, c * Lh)
        ds = pallas_dual_filter(x_e, x_o, params['Wdec_eT'], params['Wdec_oT'])
        ds = ds.reshape(3 * B, 2 * kw, c, Lh)
        d3, s3 = ds[:, :kw], ds[:, kw:]
        levels.append((d3, s3))
        cur = s3

    # ---- FFT cross-attention per level.  The reference's attn1/attn3 modules
    #      are parameter-free and identically configured, so attn(d,...) is
    #      computed once and reused for both Ud's first term and Us.
    Ud, Us = [], []
    for d3, s3 in levels:
        t_d = attn(d3[:B], d3[B:2 * B], d3[2 * B:])
        t_s = attn(s3[:B], s3[B:2 * B], s3[2 * B:])
        Ud.append(t_d + t_s)
        Us.append(t_d)
    vout = attn(cur[:B], cur[B:2 * B], cur[2 * B:])

    # ---- evenOdd reconstruction, still transposed / lane-dense, no concats.
    for i in range(ns - 1 - L_lvl, -1, -1):
        vout = vout + Us[i]
        Lm = vout.shape[-1]
        eo = pallas_dual_filter(vout.reshape(B, kw, c * Lm),
                                Ud[i].reshape(B, kw, c * Lm),
                                params['Wrec_vT'], params['Wrec_dT'])
        eo = eo.reshape(B, 2 * kw, c, Lm)
        x_e, x_o = eo[:, :kw], eo[:, kw:]
        vout = jnp.stack([x_e, x_o], axis=-1).reshape(B, kw, c, 2 * Lm)

    # ---- back to (B, N, c*k) and final projection.
    v_fin = jnp.transpose(vout[..., :N], (0, 3, 2, 1)).reshape(1, B * N, c * kw)
    out = pallas_linear_batched(v_fin, params['out_w'][None], params['out_b'][None])
    return out.reshape(B, N, ich)


# ---------------------------------------------------------------------------
# Pure-jnp reference (mirrors the torch module literally) for validation.
# ---------------------------------------------------------------------------
def reference_forward(params, q, k, v, *, cfg):
    c, kw, L_lvl, modes = cfg['c'], cfg['k'], cfg['L'], cfg['modes']
    ic, oc = cfg['in_channels'], cfg['out_channels']
    B, N, H, E = q.shape
    _, S, _, _ = k.shape
    ich = H * E

    q = q.reshape(B, N, ich)
    k = k.reshape(B, S, ich)
    v = v.reshape(B, S, ich)
    q = (jnp.matmul(q, params['Lqkv_w'][0], precision=_HP) + params['Lqkv_b'][0]).reshape(B, N, c, kw)
    k = (jnp.matmul(k, params['Lqkv_w'][1], precision=_HP) + params['Lqkv_b'][1]).reshape(B, S, c, kw)
    v = (jnp.matmul(v, params['Lqkv_w'][2], precision=_HP) + params['Lqkv_b'][2]).reshape(B, S, c, kw)

    if N > S:
        z = jnp.zeros((B, N - S, c, kw), q.dtype)
        v = jnp.concatenate([v, z], axis=1)
        k = jnp.concatenate([k, z], axis=1)
    else:
        v = v[:, :N]
        k = k[:, :N]

    ns = math.floor(math.log2(N))
    nl = 2 ** math.ceil(math.log2(N))
    q = jnp.concatenate([q, q[:, :nl - N]], axis=1)
    k = jnp.concatenate([k, k[:, :nl - N]], axis=1)
    v = jnp.concatenate([v, v[:, :nl - N]], axis=1)

    ec_d, ec_s = params['ec_d'], params['ec_s']
    rc_e, rc_o = params['rc_e'], params['rc_o']

    def wavelet_transform(x):
        xa = jnp.concatenate([x[:, ::2], x[:, 1::2]], axis=-1)
        return (jnp.matmul(xa, ec_d, precision=_HP),
                jnp.matmul(xa, ec_s, precision=_HP))

    def even_odd(x):
        Bx, Nx, cx, _ = x.shape
        x_e = jnp.matmul(x, rc_e, precision=_HP)
        x_o = jnp.matmul(x, rc_o, precision=_HP)
        out = jnp.zeros((Bx, Nx * 2, cx, kw), x.dtype)
        return out.at[:, ::2].set(x_e).at[:, 1::2].set(x_o)

    def attn(q_, k_, v_):
        B_, L_, E_, H_ = q_.shape
        xq = jnp.transpose(q_, (0, 3, 2, 1))
        xk = jnp.transpose(k_, (0, 3, 2, 1))
        xv = jnp.transpose(v_, (0, 3, 2, 1))
        mq = min(L_ // 2, modes)
        mkv = min(xv.shape[-1] // 2, modes)
        if mq == 0 or mkv == 0:
            return jnp.zeros_like(q_)
        xq_ft = jnp.fft.rfft(xq, axis=-1)[..., :mq]
        xk_ft = jnp.fft.rfft(xk, axis=-1)[..., :mkv]
        xqk = jnp.tanh(jnp.einsum('bhex,bhey->bhxy', xq_ft, xk_ft, precision=_HP))
        xqkv = jnp.einsum('bhxy,bhey->bhex', xqk, xk_ft, precision=_HP)
        out_ft = jnp.zeros((B_, H_, E_, L_ // 2 + 1), xqkv.dtype).at[..., :mq].set(xqkv)
        out = jnp.fft.irfft(out_ft / ic / oc, n=L_, axis=-1)
        return jnp.transpose(out, (0, 3, 2, 1)).astype(q_.dtype)

    Ud_q, Us_q, Ud_k, Us_k, Ud_v, Us_v = [], [], [], [], [], []
    for _ in range(ns - L_lvl):
        d, q = wavelet_transform(q); Ud_q.append((d, q)); Us_q.append(d)
    for _ in range(ns - L_lvl):
        d, k = wavelet_transform(k); Ud_k.append((d, k)); Us_k.append(d)
    for _ in range(ns - L_lvl):
        d, v = wavelet_transform(v); Ud_v.append((d, v)); Us_v.append(d)

    Ud, Us = [], []
    for i in range(ns - L_lvl):
        dq, sq = Ud_q[i], Us_q[i]
        dk, sk = Ud_k[i], Us_k[i]
        dv, sv = Ud_v[i], Us_v[i]
        Ud.append(attn(dq[0], dk[0], dv[0]) + attn(dq[1], dk[1], dv[1]))
        Us.append(attn(sq, sk, sv))
    v = attn(q, k, v)

    for i in range(ns - 1 - L_lvl, -1, -1):
        v = v + Us[i]
        v = jnp.concatenate([v, Ud[i]], axis=-1)
        v = even_odd(v)

    v = v[:, :N].reshape(B, N, c * kw)
    return jnp.matmul(v, params['out_w'], precision=_HP) + params['out_b']


# ---------------------------------------------------------------------------
if __name__ == "__main__":
    # Small shapes consistent with the module: q/k/v are (B, N, H, E), ich=H*E.
    B, N, S = 2, 8, 8
    H_heads, E = 4, 8
    ich = H_heads * E          # 32
    c, kw = 4, 8               # c * k = 32 (k=8 matches the module default)
    cfg = dict(c=c, k=kw, L=0, modes=4, in_channels=ich, out_channels=ich)

    ec_s, ec_d, rc_e, rc_o = _legendre_filters(kw)

    key = jax.random.PRNGKey(0)
    ks = jax.random.split(key, 8)
    f32 = jnp.float32

    def winit(kk, shape, fan_in):
        return (jax.random.normal(kk, shape, f32) / np.sqrt(fan_in)).astype(f32)

    ec_d_j = jnp.asarray(ec_d, f32); ec_s_j = jnp.asarray(ec_s, f32)
    rc_e_j = jnp.asarray(rc_e, f32); rc_o_j = jnp.asarray(rc_o, f32)

    params = {
        # fused Q/K/V projection weights, leading axis of 3 (q, k, v)
        'Lqkv_w': jnp.stack([winit(ks[0], (ich, c * kw), ich),
                             winit(ks[1], (ich, c * kw), ich),
                             winit(ks[2], (ich, c * kw), ich)], axis=0),
        'Lqkv_b': 0.1 * jax.random.normal(ks[3], (3, c * kw), f32),
        'out_w': winit(ks[4], (c * kw, ich), c * kw),
        'out_b': jnp.zeros((ich,), f32),
        # raw filters (used by the jnp reference path)
        'ec_d': ec_d_j, 'ec_s': ec_s_j, 'rc_e': rc_e_j, 'rc_o': rc_o_j,
        # fused + pre-transposed filters for the lane-dense Pallas kernels:
        #   decomposition:  [d | s] = x_even @ W_e + x_odd @ W_o
        'Wdec_eT': jnp.concatenate([ec_d_j[:kw], ec_s_j[:kw]], axis=1).T,
        'Wdec_oT': jnp.concatenate([ec_d_j[kw:], ec_s_j[kw:]], axis=1).T,
        #   reconstruction: [x_e | x_o] = v @ W_v + Ud @ W_d
        'Wrec_vT': jnp.concatenate([rc_e_j[:kw], rc_o_j[:kw]], axis=1).T,
        'Wrec_dT': jnp.concatenate([rc_e_j[kw:], rc_o_j[kw:]], axis=1).T,
    }
    # TODO(synk): the reference defines self.T0 = nn.Linear(k, k) but never uses
    # it in forward(); intentionally omitted.

    q_in = jax.random.normal(ks[5], (B, N, H_heads, E), f32)
    k_in = jax.random.normal(ks[6], (B, S, H_heads, E), f32)
    v_in = jax.random.normal(ks[7], (B, S, H_heads, E), f32)

    fwd_pallas = jax.jit(functools.partial(multiwavelet_cross_forward, cfg=cfg))
    fwd_ref = jax.jit(functools.partial(reference_forward, cfg=cfg))

    out = jax.block_until_ready(fwd_pallas(params, q_in, k_in, v_in))
    ref = jax.block_until_ready(fwd_ref(params, q_in, k_in, v_in))

    assert out.shape == (B, N, ich)
    assert bool(jnp.all(jnp.isfinite(out)))
    err = float(jnp.max(jnp.abs(out - ref)))
    scale = float(jnp.max(jnp.abs(ref))) + 1e-12
    assert err <= 1e-4 * scale + 1e-5, f"Pallas vs jnp mismatch: err={err}, scale={scale}"
    print("KERNEL_OK")
</pallas_src>

<mosaic_0001>
module attributes {stable_mosaic.version = 11 : i64} {
  func.func @_dual_filter_kernel(%arg0: i32, %arg1: i32, %arg2: memref<1x8x4xf32, #tpu.memory_space<vmem>>, %arg3: memref<1x8x4xf32, #tpu.memory_space<vmem>>, %arg4: memref<16x8xf32, #tpu.memory_space<vmem>>, %arg5: memref<16x8xf32, #tpu.memory_space<vmem>>, %arg6: memref<1x16x4xf32, #tpu.memory_space<vmem>>) attributes {dimension_semantics = [#tpu.dimension_semantics<parallel>, #tpu.dimension_semantics<parallel>], iteration_bounds = array<i64: 2, 1>, scalar_prefetch = 0 : i64, scratch_operands = 0 : i64, tpu.core_type = #tpu.core_type<tc>, window_params = [{transform_indices = @transform_0, window_bounds = array<i64: 1, 8, 4>}, {transform_indices = @transform_1, window_bounds = array<i64: 1, 8, 4>}, {pipeline_mode = #tpu.pipeline_mode<synchronous>, transform_indices = @transform_2, window_bounds = array<i64: 16, 8>}, {pipeline_mode = #tpu.pipeline_mode<synchronous>, transform_indices = @transform_3, window_bounds = array<i64: 16, 8>}, {transform_indices = @transform_4, window_bounds = array<i64: 1, 16, 4>}]} {
    %c0 = arith.constant 0 : index
    %c0_0 = arith.constant 0 : index
    %0 = vector.load %arg4[%c0, %c0_0] : memref<16x8xf32, #tpu.memory_space<vmem>>, vector<16x8xf32>
    %c0_1 = arith.constant 0 : index
    %c0_2 = arith.constant 0 : index
    %c0_3 = arith.constant 0 : index
    %1 = vector.load %arg2[%c0_1, %c0_2, %c0_3] : memref<1x8x4xf32, #tpu.memory_space<vmem>>, vector<1x8x4xf32>
    %2 = vector.shape_cast %1 : vector<1x8x4xf32> to vector<8x4xf32>
    %cst = arith.constant dense<0.000000e+00> : vector<16x4xf32>
    %3 = tpu.matmul %0, %2, %cst {dimension_numbers = #tpu.dot_dimension_numbers<[1], [0], [0], [1], [0, 0, 1, 1], [], []>, precision = #tpu.contract_precision<fp32>} : vector<16x8xf32>, vector<8x4xf32>, vector<16x4xf32> -> vector<16x4xf32>
    %c0_4 = arith.constant 0 : index
    %c0_5 = arith.constant 0 : index
    %4 = vector.load %arg5[%c0_4, %c0_5] : memref<16x8xf32, #tpu.memory_space<vmem>>, vector<16x8xf32>
    %c0_6 = arith.constant 0 : index
    %c0_7 = arith.constant 0 : index
    %c0_8 = arith.constant 0 : index
    %5 = vector.load %arg3[%c0_6, %c0_7, %c0_8] : memref<1x8x4xf32, #tpu.memory_space<vmem>>, vector<1x8x4xf32>
    %6 = vector.shape_cast %5 : vector<1x8x4xf32> to vector<8x4xf32>
    %cst_9 = arith.constant dense<0.000000e+00> : vector<16x4xf32>
    %7 = tpu.matmul %4, %6, %cst_9 {dimension_numbers = #tpu.dot_dimension_numbers<[1], [0], [0], [1], [0, 0, 1, 1], [], []>, precision = #tpu.contract_precision<fp32>} : vector<16x8xf32>, vector<8x4xf32>, vector<16x4xf32> -> vector<16x4xf32>
    %8 = arith.addf %3, %7 : vector<16x4xf32>
    %c0_10 = arith.constant 0 : index
    %c0_11 = arith.constant 0 : index
    %c0_12 = arith.constant 0 : index
    %9 = vector.load %arg6[%c0_10, %c0_11, %c0_12] : memref<1x16x4xf32, #tpu.memory_space<vmem>>, vector<1x16x4xf32>
    %10 = vector.shape_cast %9 : vector<1x16x4xf32> to vector<16x4xf32>
    %11 = vector.shape_cast %8 : vector<16x4xf32> to vector<1x16x4xf32>
    tpu.vector_store %arg6[%c0_10, %c0_11, %c0_12], %11 {strides = array<i32>} : memref<1x16x4xf32, #tpu.memory_space<vmem>>, vector<1x16x4xf32>,
    return
  }
  func.func @transform_0(%arg0: i32, %arg1: i32) -> (i32, i32, i32) {
    %c0_i32 = arith.constant 0 : i32
    %c0_i32_0 = arith.constant 0 : i32
    return %arg0, %c0_i32, %arg1 : i32, i32, i32
  }
  func.func @transform_1(%arg0: i32, %arg1: i32) -> (i32, i32, i32) {
    %c0_i32 = arith.constant 0 : i32
    %c0_i32_0 = arith.constant 0 : i32
    return %arg0, %c0_i32, %arg1 : i32, i32, i32
  }
  func.func @transform_2(%arg0: i32, %arg1: i32) -> (i32, i32) {
    %c0_i32 = arith.constant 0 : i32
    %c0_i32_0 = arith.constant 0 : i32
    %c0_i32_1 = arith.constant 0 : i32
    return %c0_i32, %c0_i32_0 : i32, i32
  }
  func.func @transform_3(%arg0: i32, %arg1: i32) -> (i32, i32) {
    %c0_i32 = arith.constant 0 : i32
    %c0_i32_0 = arith.constant 0 : i32
    %c0_i32_1 = arith.constant 0 : i32
    return %c0_i32, %c0_i32_0 : i32, i32
  }
  func.func @transform_4(%arg0: i32, %arg1: i32) -> (i32, i32, i32) {
    %c0_i32 = arith.constant 0 : i32
    %c0_i32_0 = arith.constant 0 : i32
    return %arg0, %c0_i32, %arg1 : i32, i32, i32
  }
}

module attributes {stable_mosaic.version = 11 : i64} {
  func.func @_linear_single_k_kernel(%arg0: i32, %arg1: i32, %arg2: i32, %arg3: memref<1x16x32xf32, #tpu.memory_space<vmem>>, %arg4: memref<1x32x32xf32, #tpu.memory_space<vmem>>, %arg5: memref<1x1x32xf32, #tpu.memory_space<vmem>>, %arg6: memref<1x16x32xf32, #tpu.memory_space<vmem>>) attributes {dimension_semantics = [#tpu.dimension_semantics<parallel>, #tpu.dimension_semantics<parallel>, #tpu.dimension_semantics<parallel>], iteration_bounds = array<i64: 3, 1, 1>, scalar_prefetch = 0 : i64, scratch_operands = 0 : i64, tpu.core_type = #tpu.core_type<tc>, window_params = [{transform_indices = @transform_0, window_bounds = array<i64: 1, 16, 32>}, {transform_indices = @transform_1, window_bounds = array<i64: 1, 32, 32>}, {transform_indices = @transform_2, window_bounds = array<i64: 1, 1, 32>}, {transform_indices = @transform_3, window_bounds = array<i64: 1, 16, 32>}]} {
    %c0 = arith.constant 0 : index
    %c0_0 = arith.constant 0 : index
    %c0_1 = arith.constant 0 : index
    %0 = vector.load %arg3[%c0, %c0_0, %c0_1] : memref<1x16x32xf32, #tpu.memory_space<vmem>>, vector<1x16x32xf32>
    %1 = vector.shape_cast %0 : vector<1x16x32xf32> to vector<16x32xf32>
    %c0_2 = arith.constant 0 : index
    %c0_3 = arith.constant 0 : index
    %c0_4 = arith.constant 0 : index
    %2 = vector.load %arg4[%c0_2, %c0_3, %c0_4] : memref<1x32x32xf32, #tpu.memory_space<vmem>>, vector<1x32x32xf32>
    %3 = vector.shape_cast %2 : vector<1x32x32xf32> to vector<32x32xf32>
    %cst = arith.constant dense<0.000000e+00> : vector<16x32xf32>
    %4 = tpu.matmul %1, %3, %cst {dimension_numbers = #tpu.dot_dimension_numbers<[1], [0], [0], [1], [0, 0, 1, 1], [], []>, precision = #tpu.contract_precision<fp32>} : vector<16x32xf32>, vector<32x32xf32>, vector<16x32xf32> -> vector<16x32xf32>
    %c0_5 = arith.constant 0 : index
    %c0_6 = arith.constant 0 : index
    %c0_7 = arith.constant 0 : index
    %5 = vector.load %arg5[%c0_5, %c0_6, %c0_7] : memref<1x1x32xf32, #tpu.memory_space<vmem>>, vector<1x1x32xf32>
    %6 = vector.shape_cast %5 : vector<1x1x32xf32> to vector<1x32xf32>
    %7 = vector.broadcast %6 : vector<1x32xf32> to vector<16x32xf32>
    %8 = arith.addf %4, %7 : vector<16x32xf32>
    %c0_8 = arith.constant 0 : index
    %c0_9 = arith.constant 0 : index
    %c0_10 = arith.constant 0 : index
    %9 = vector.load %arg6[%c0_8, %c0_9, %c0_10] : memref<1x16x32xf32, #tpu.memory_space<vmem>>, vector<1x16x32xf32>
    %10 = vector.shape_cast %9 : vector<1x16x32xf32> to vector<16x32xf32>
    %11 = vector.shape_cast %8 : vector<16x32xf32> to vector<1x16x32xf32>
    tpu.vector_store %arg6[%c0_8, %c0_9, %c0_10], %11 {strides = array<i32>} : memref<1x16x32xf32, #tpu.memory_space<vmem>>, vector<1x16x32xf32>,
    return
  }
  func.func @transform_0(%arg0: i32, %arg1: i32, %arg2: i32) -> (i32, i32, i32) {
    %c0_i32 = arith.constant 0 : i32
    %c0_i32_0 = arith.constant 0 : i32
    return %arg0, %arg1, %c0_i32 : i32, i32, i32
  }
  func.func @transform_1(%arg0: i32, %arg1: i32, %arg2: i32) -> (i32, i32, i32) {
    %c0_i32 = arith.constant 0 : i32
    %c0_i32_0 = arith.constant 0 : i32
    return %arg0, %c0_i32, %arg2 : i32, i32, i32
  }
  func.func @transform_2(%arg0: i32, %arg1: i32, %arg2: i32) -> (i32, i32, i32) {
    %c0_i32 = arith.constant 0 : i32
    %c0_i32_0 = arith.constant 0 : i32
    return %arg0, %c0_i32, %arg2 : i32, i32, i32
  }
  func.func @transform_3(%arg0: i32, %arg1: i32, %arg2: i32) -> (i32, i32, i32) {
    %c0_i32 = arith.constant 0 : i32
    return %arg0, %arg1, %arg2 : i32, i32, i32
  }
}

module attributes {stable_mosaic.version = 11 : i64} {
  func.func @_dual_filter_kernel(%arg0: i32, %arg1: i32, %arg2: memref<1x8x16xf32, #tpu.memory_space<vmem>>, %arg3: memref<1x8x16xf32, #tpu.memory_space<vmem>>, %arg4: memref<16x8xf32, #tpu.memory_space<vmem>>, %arg5: memref<16x8xf32, #tpu.memory_space<vmem>>, %arg6: memref<1x16x16xf32, #tpu.memory_space<vmem>>) attributes {dimension_semantics = [#tpu.dimension_semantics<parallel>, #tpu.dimension_semantics<parallel>], iteration_bounds = array<i64: 6, 1>, scalar_prefetch = 0 : i64, scratch_operands = 0 : i64, tpu.core_type = #tpu.core_type<tc>, window_params = [{transform_indices = @transform_0, window_bounds = array<i64: 1, 8, 16>}, {transform_indices = @transform_1, window_bounds = array<i64: 1, 8, 16>}, {pipeline_mode = #tpu.pipeline_mode<synchronous>, transform_indices = @transform_2, window_bounds = array<i64: 16, 8>}, {pipeline_mode = #tpu.pipeline_mode<synchronous>, transform_indices = @transform_3, window_bounds = array<i64: 16, 8>}, {transform_indices = @transform_4, window_bounds = array<i64: 1, 16, 16>}]} {
    %c0 = arith.constant 0 : index
    %c0_0 = arith.constant 0 : index
    %0 = vector.load %arg4[%c0, %c0_0] : memref<16x8xf32, #tpu.memory_space<vmem>>, vector<16x8xf32>
    %c0_1 = arith.constant 0 : index
    %c0_2 = arith.constant 0 : index
    %c0_3 = arith.constant 0 : index
    %1 = vector.load %arg2[%c0_1, %c0_2, %c0_3] : memref<1x8x16xf32, #tpu.memory_space<vmem>>, vector<1x8x16xf32>
    %2 = vector.shape_cast %1 : vector<1x8x16xf32> to vector<8x16xf32>
    %cst = arith.constant dense<0.000000e+00> : vector<16x16xf32>
    %3 = tpu.matmul %0, %2, %cst {dimension_numbers = #tpu.dot_dimension_numbers<[1], [0], [0], [1], [0, 0, 1, 1], [], []>, precision = #tpu.contract_precision<fp32>} : vector<16x8xf32>, vector<8x16xf32>, vector<16x16xf32> -> vector<16x16xf32>
    %c0_4 = arith.constant 0 : index
    %c0_5 = arith.constant 0 : index
    %4 = vector.load %arg5[%c0_4, %c0_5] : memref<16x8xf32, #tpu.memory_space<vmem>>, vector<16x8xf32>
    %c0_6 = arith.constant 0 : index
    %c0_7 = arith.constant 0 : index
    %c0_8 = arith.constant 0 : index
    %5 = vector.load %arg3[%c0_6, %c0_7, %c0_8] : memref<1x8x16xf32, #tpu.memory_space<vmem>>, vector<1x8x16xf32>
    %6 = vector.shape_cast %5 : vector<1x8x16xf32> to vector<8x16xf32>
    %cst_9 = arith.constant dense<0.000000e+00> : vector<16x16xf32>
    %7 = tpu.matmul %4, %6, %cst_9 {dimension_numbers = #tpu.dot_dimension_numbers<[1], [0], [0], [1], [0, 0, 1, 1], [], []>, precision = #tpu.contract_precision<fp32>} : vector<16x8xf32>, vector<8x16xf32>, vector<16x16xf32> -> vector<16x16xf32>
    %8 = arith.addf %3, %7 : vector<16x16xf32>
    %c0_10 = arith.constant 0 : index
    %c0_11 = arith.constant 0 : index
    %c0_12 = arith.constant 0 : index
    %9 = vector.load %arg6[%c0_10, %c0_11, %c0_12] : memref<1x16x16xf32, #tpu.memory_space<vmem>>, vector<1x16x16xf32>
    %10 = vector.shape_cast %9 : vector<1x16x16xf32> to vector<16x16xf32>
    %11 = vector.shape_cast %8 : vector<16x16xf32> to vector<1x16x16xf32>
    tpu.vector_store %arg6[%c0_10, %c0_11, %c0_12], %11 {strides = array<i32>} : memref<1x16x16xf32, #tpu.memory_space<vmem>>, vector<1x16x16xf32>,
    return
  }
  func.func @transform_0(%arg0: i32, %arg1: i32) -> (i32, i32, i32) {
    %c0_i32 = arith.constant 0 : i32
    %c0_i32_0 = arith.constant 0 : i32
    return %arg0, %c0_i32, %arg1 : i32, i32, i32
  }
  func.func @transform_1(%arg0: i32, %arg1: i32) -> (i32, i32, i32) {
    %c0_i32 = arith.constant 0 : i32
    %c0_i32_0 = arith.constant 0 : i32
    return %arg0, %c0_i32, %arg1 : i32, i32, i32
  }
  func.func @transform_2(%arg0: i32, %arg1: i32) -> (i32, i32) {
    %c0_i32 = arith.constant 0 : i32
    %c0_i32_0 = arith.constant 0 : i32
    %c0_i32_1 = arith.constant 0 : i32
    return %c0_i32, %c0_i32_0 : i32, i32
  }
  func.func @transform_3(%arg0: i32, %arg1: i32) -> (i32, i32) {
    %c0_i32 = arith.constant 0 : i32
    %c0_i32_0 = arith.constant 0 : i32
    %c0_i32_1 = arith.constant 0 : i32
    return %c0_i32, %c0_i32_0 : i32, i32
  }
  func.func @transform_4(%arg0: i32, %arg1: i32) -> (i32, i32, i32) {
    %c0_i32 = arith.constant 0 : i32
    %c0_i32_0 = arith.constant 0 : i32
    return %arg0, %c0_i32, %arg1 : i32, i32, i32
  }
}

module attributes {stable_mosaic.version = 11 : i64} {
  func.func @_dual_filter_kernel(%arg0: i32, %arg1: i32, %arg2: memref<1x8x8xf32, #tpu.memory_space<vmem>>, %arg3: memref<1x8x8xf32, #tpu.memory_space<vmem>>, %arg4: memref<16x8xf32, #tpu.memory_space<vmem>>, %arg5: memref<16x8xf32, #tpu.memory_space<vmem>>, %arg6: memref<1x16x8xf32, #tpu.memory_space<vmem>>) attributes {dimension_semantics = [#tpu.dimension_semantics<parallel>, #tpu.dimension_semantics<parallel>], iteration_bounds = array<i64: 6, 1>, scalar_prefetch = 0 : i64, scratch_operands = 0 : i64, tpu.core_type = #tpu.core_type<tc>, window_params = [{transform_indices = @transform_0, window_bounds = array<i64: 1, 8, 8>}, {transform_indices = @transform_1, window_bounds = array<i64: 1, 8, 8>}, {pipeline_mode = #tpu.pipeline_mode<synchronous>, transform_indices = @transform_2, window_bounds = array<i64: 16, 8>}, {pipeline_mode = #tpu.pipeline_mode<synchronous>, transform_indices = @transform_3, window_bounds = array<i64: 16, 8>}, {transform_indices = @transform_4, window_bounds = array<i64: 1, 16, 8>}]} {
    %c0 = arith.constant 0 : index
    %c0_0 = arith.constant 0 : index
    %0 = vector.load %arg4[%c0, %c0_0] : memref<16x8xf32, #tpu.memory_space<vmem>>, vector<16x8xf32>
    %c0_1 = arith.constant 0 : index
    %c0_2 = arith.constant 0 : index
    %c0_3 = arith.constant 0 : index
    %1 = vector.load %arg2[%c0_1, %c0_2, %c0_3] : memref<1x8x8xf32, #tpu.memory_space<vmem>>, vector<1x8x8xf32>
    %2 = vector.shape_cast %1 : vector<1x8x8xf32> to vector<8x8xf32>
    %cst = arith.constant dense<0.000000e+00> : vector<16x8xf32>
    %3 = tpu.matmul %0, %2, %cst {dimension_numbers = #tpu.dot_dimension_numbers<[1], [0], [0], [1], [0, 0, 1, 1], [], []>, precision = #tpu.contract_precision<fp32>} : vector<16x8xf32>, vector<8x8xf32>, vector<16x8xf32> -> vector<16x8xf32>
    %c0_4 = arith.constant 0 : index
    %c0_5 = arith.constant 0 : index
    %4 = vector.load %arg5[%c0_4, %c0_5] : memref<16x8xf32, #tpu.memory_space<vmem>>, vector<16x8xf32>
    %c0_6 = arith.constant 0 : index
    %c0_7 = arith.constant 0 : index
    %c0_8 = arith.constant 0 : index
    %5 = vector.load %arg3[%c0_6, %c0_7, %c0_8] : memref<1x8x8xf32, #tpu.memory_space<vmem>>, vector<1x8x8xf32>
    %6 = vector.shape_cast %5 : vector<1x8x8xf32> to vector<8x8xf32>
    %cst_9 = arith.constant dense<0.000000e+00> : vector<16x8xf32>
    %7 = tpu.matmul %4, %6, %cst_9 {dimension_numbers = #tpu.dot_dimension_numbers<[1], [0], [0], [1], [0, 0, 1, 1], [], []>, precision = #tpu.contract_precision<fp32>} : vector<16x8xf32>, vector<8x8xf32>, vector<16x8xf32> -> vector<16x8xf32>
    %8 = arith.addf %3, %7 : vector<16x8xf32>
    %c0_10 = arith.constant 0 : index
    %c0_11 = arith.constant 0 : index
    %c0_12 = arith.constant 0 : index
    %9 = vector.load %arg6[%c0_10, %c0_11, %c0_12] : memref<1x16x8xf32, #tpu.memory_space<vmem>>, vector<1x16x8xf32>
    %10 = vector.shape_cast %9 : vector<1x16x8xf32> to vector<16x8xf32>
    %11 = vector.shape_cast %8 : vector<16x8xf32> to vector<1x16x8xf32>
    tpu.vector_store %arg6[%c0_10, %c0_11, %c0_12], %11 {strides = array<i32>} : memref<1x16x8xf32, #tpu.memory_space<vmem>>, vector<1x16x8xf32>,
    return
  }
  func.func @transform_0(%arg0: i32, %arg1: i32) -> (i32, i32, i32) {
    %c0_i32 = arith.constant 0 : i32
    %c0_i32_0 = arith.constant 0 : i32
    return %arg0, %c0_i32, %arg1 : i32, i32, i32
  }
  func.func @transform_1(%arg0: i32, %arg1: i32) -> (i32, i32, i32) {
    %c0_i32 = arith.constant 0 : i32
    %c0_i32_0 = arith.constant 0 : i32
    return %arg0, %c0_i32, %arg1 : i32, i32, i32
  }
  func.func @transform_2(%arg0: i32, %arg1: i32) -> (i32, i32) {
    %c0_i32 = arith.constant 0 : i32
    %c0_i32_0 = arith.constant 0 : i32
    %c0_i32_1 = arith.constant 0 : i32
    return %c0_i32, %c0_i32_0 : i32, i32
  }
  func.func @transform_3(%arg0: i32, %arg1: i32) -> (i32, i32) {
    %c0_i32 = arith.constant 0 : i32
    %c0_i32_0 = arith.constant 0 : i32
    %c0_i32_1 = arith.constant 0 : i32
    return %c0_i32, %c0_i32_0 : i32, i32
  }
  func.func @transform_4(%arg0: i32, %arg1: i32) -> (i32, i32, i32) {
    %c0_i32 = arith.constant 0 : i32
    %c0_i32_0 = arith.constant 0 : i32
    return %arg0, %c0_i32, %arg1 : i32, i32, i32
  }
}

module attributes {stable_mosaic.version = 11 : i64} {
  func.func @_dual_filter_kernel(%arg0: i32, %arg1: i32, %arg2: memref<1x8x8xf32, #tpu.memory_space<vmem>>, %arg3: memref<1x8x8xf32, #tpu.memory_space<vmem>>, %arg4: memref<16x8xf32, #tpu.memory_space<vmem>>, %arg5: memref<16x8xf32, #tpu.memory_space<vmem>>, %arg6: memref<1x16x8xf32, #tpu.memory_space<vmem>>) attributes {dimension_semantics = [#tpu.dimension_semantics<parallel>, #tpu.dimension_semantics<parallel>], iteration_bounds = array<i64: 2, 1>, scalar_prefetch = 0 : i64, scratch_operands = 0 : i64, tpu.core_type = #tpu.core_type<tc>, window_params = [{transform_indices = @transform_0, window_bounds = array<i64: 1, 8, 8>}, {transform_indices = @transform_1, window_bounds = array<i64: 1, 8, 8>}, {pipeline_mode = #tpu.pipeline_mode<synchronous>, transform_indices = @transform_2, window_bounds = array<i64: 16, 8>}, {pipeline_mode = #tpu.pipeline_mode<synchronous>, transform_indices = @transform_3, window_bounds = array<i64: 16, 8>}, {transform_indices = @transform_4, window_bounds = array<i64: 1, 16, 8>}]} {
    %c0 = arith.constant 0 : index
    %c0_0 = arith.constant 0 : index
    %0 = vector.load %arg4[%c0, %c0_0] : memref<16x8xf32, #tpu.memory_space<vmem>>, vector<16x8xf32>
    %c0_1 = arith.constant 0 : index
    %c0_2 = arith.constant 0 : index
    %c0_3 = arith.constant 0 : index
    %1 = vector.load %arg2[%c0_1, %c0_2, %c0_3] : memref<1x8x8xf32, #tpu.memory_space<vmem>>, vector<1x8x8xf32>
    %2 = vector.shape_cast %1 : vector<1x8x8xf32> to vector<8x8xf32>
    %cst = arith.constant dense<0.000000e+00> : vector<16x8xf32>
    %3 = tpu.matmul %0, %2, %cst {dimension_numbers = #tpu.dot_dimension_numbers<[1], [0], [0], [1], [0, 0, 1, 1], [], []>, precision = #tpu.contract_precision<fp32>} : vector<16x8xf32>, vector<8x8xf32>, vector<16x8xf32> -> vector<16x8xf32>
    %c0_4 = arith.constant 0 : index
    %c0_5 = arith.constant 0 : index
    %4 = vector.load %arg5[%c0_4, %c0_5] : memref<16x8xf32, #tpu.memory_space<vmem>>, vector<16x8xf32>
    %c0_6 = arith.constant 0 : index
    %c0_7 = arith.constant 0 : index
    %c0_8 = arith.constant 0 : index
    %5 = vector.load %arg3[%c0_6, %c0_7, %c0_8] : memref<1x8x8xf32, #tpu.memory_space<vmem>>, vector<1x8x8xf32>
    %6 = vector.shape_cast %5 : vector<1x8x8xf32> to vector<8x8xf32>
    %cst_9 = arith.constant dense<0.000000e+00> : vector<16x8xf32>
    %7 = tpu.matmul %4, %6, %cst_9 {dimension_numbers = #tpu.dot_dimension_numbers<[1], [0], [0], [1], [0, 0, 1, 1], [], []>, precision = #tpu.contract_precision<fp32>} : vector<16x8xf32>, vector<8x8xf32>, vector<16x8xf32> -> vector<16x8xf32>
    %8 = arith.addf %3, %7 : vector<16x8xf32>
    %c0_10 = arith.constant 0 : index
    %c0_11 = arith.constant 0 : index
    %c0_12 = arith.constant 0 : index
    %9 = vector.load %arg6[%c0_10, %c0_11, %c0_12] : memref<1x16x8xf32, #tpu.memory_space<vmem>>, vector<1x16x8xf32>
    %10 = vector.shape_cast %9 : vector<1x16x8xf32> to vector<16x8xf32>
    %11 = vector.shape_cast %8 : vector<16x8xf32> to vector<1x16x8xf32>
    tpu.vector_store %arg6[%c0_10, %c0_11, %c0_12], %11 {strides = array<i32>} : memref<1x16x8xf32, #tpu.memory_space<vmem>>, vector<1x16x8xf32>,
    return
  }
  func.func @transform_0(%arg0: i32, %arg1: i32) -> (i32, i32, i32) {
    %c0_i32 = arith.constant 0 : i32
    %c0_i32_0 = arith.constant 0 : i32
    return %arg0, %c0_i32, %arg1 : i32, i32, i32
  }
  func.func @transform_1(%arg0: i32, %arg1: i32) -> (i32, i32, i32) {
    %c0_i32 = arith.constant 0 : i32
    %c0_i32_0 = arith.constant 0 : i32
    return %arg0, %c0_i32, %arg1 : i32, i32, i32
  }
  func.func @transform_2(%arg0: i32, %arg1: i32) -> (i32, i32) {
    %c0_i32 = arith.constant 0 : i32
    %c0_i32_0 = arith.constant 0 : i32
    %c0_i32_1 = arith.constant 0 : i32
    return %c0_i32, %c0_i32_0 : i32, i32
  }
  func.func @transform_3(%arg0: i32, %arg1: i32) -> (i32, i32) {
    %c0_i32 = arith.constant 0 : i32
    %c0_i32_0 = arith.constant 0 : i32
    %c0_i32_1 = arith.constant 0 : i32
    return %c0_i32, %c0_i32_0 : i32, i32
  }
  func.func @transform_4(%arg0: i32, %arg1: i32) -> (i32, i32, i32) {
    %c0_i32 = arith.constant 0 : i32
    %c0_i32_0 = arith.constant 0 : i32
    return %arg0, %c0_i32, %arg1 : i32, i32, i32
  }
}

module attributes {stable_mosaic.version = 11 : i64} {
  func.func @_dual_filter_kernel(%arg0: i32, %arg1: i32, %arg2: memref<1x8x16xf32, #tpu.memory_space<vmem>>, %arg3: memref<1x8x16xf32, #tpu.memory_space<vmem>>, %arg4: memref<16x8xf32, #tpu.memory_space<vmem>>, %arg5: memref<16x8xf32, #tpu.memory_space<vmem>>, %arg6: memref<1x16x16xf32, #tpu.memory_space<vmem>>) attributes {dimension_semantics = [#tpu.dimension_semantics<parallel>, #tpu.dimension_semantics<parallel>], iteration_bounds = array<i64: 2, 1>, scalar_prefetch = 0 : i64, scratch_operands = 0 : i64, tpu.core_type = #tpu.core_type<tc>, window_params = [{transform_indices = @transform_0, window_bounds = array<i64: 1, 8, 16>}, {transform_indices = @transform_1, window_bounds = array<i64: 1, 8, 16>}, {pipeline_mode = #tpu.pipeline_mode<synchronous>, transform_indices = @transform_2, window_bounds = array<i64: 16, 8>}, {pipeline_mode = #tpu.pipeline_mode<synchronous>, transform_indices = @transform_3, window_bounds = array<i64: 16, 8>}, {transform_indices = @transform_4, window_bounds = array<i64: 1, 16, 16>}]} {
    %c0 = arith.constant 0 : index
    %c0_0 = arith.constant 0 : index
    %0 = vector.load %arg4[%c0, %c0_0] : memref<16x8xf32, #tpu.memory_space<vmem>>, vector<16x8xf32>
    %c0_1 = arith.constant 0 : index
    %c0_2 = arith.constant 0 : index
    %c0_3 = arith.constant 0 : index
    %1 = vector.load %arg2[%c0_1, %c0_2, %c0_3] : memref<1x8x16xf32, #tpu.memory_space<vmem>>, vector<1x8x16xf32>
    %2 = vector.shape_cast %1 : vector<1x8x16xf32> to vector<8x16xf32>
    %cst = arith.constant dense<0.000000e+00> : vector<16x16xf32>
    %3 = tpu.matmul %0, %2, %cst {dimension_numbers = #tpu.dot_dimension_numbers<[1], [0], [0], [1], [0, 0, 1, 1], [], []>, precision = #tpu.contract_precision<fp32>} : vector<16x8xf32>, vector<8x16xf32>, vector<16x16xf32> -> vector<16x16xf32>
    %c0_4 = arith.constant 0 : index
    %c0_5 = arith.constant 0 : index
    %4 = vector.load %arg5[%c0_4, %c0_5] : memref<16x8xf32, #tpu.memory_space<vmem>>, vector<16x8xf32>
    %c0_6 = arith.constant 0 : index
    %c0_7 = arith.constant 0 : index
    %c0_8 = arith.constant 0 : index
    %5 = vector.load %arg3[%c0_6, %c0_7, %c0_8] : memref<1x8x16xf32, #tpu.memory_space<vmem>>, vector<1x8x16xf32>
    %6 = vector.shape_cast %5 : vector<1x8x16xf32> to vector<8x16xf32>
    %cst_9 = arith.constant dense<0.000000e+00> : vector<16x16xf32>
    %7 = tpu.matmul %4, %6, %cst_9 {dimension_numbers = #tpu.dot_dimension_numbers<[1], [0], [0], [1], [0, 0, 1, 1], [], []>, precision = #tpu.contract_precision<fp32>} : vector<16x8xf32>, vector<8x16xf32>, vector<16x16xf32> -> vector<16x16xf32>
    %8 = arith.addf %3, %7 : vector<16x16xf32>
    %c0_10 = arith.constant 0 : index
    %c0_11 = arith.constant 0 : index
    %c0_12 = arith.constant 0 : index
    %9 = vector.load %arg6[%c0_10, %c0_11, %c0_12] : memref<1x16x16xf32, #tpu.memory_space<vmem>>, vector<1x16x16xf32>
    %10 = vector.shape_cast %9 : vector<1x16x16xf32> to vector<16x16xf32>
    %11 = vector.shape_cast %8 : vector<16x16xf32> to vector<1x16x16xf32>
    tpu.vector_store %arg6[%c0_10, %c0_11, %c0_12], %11 {strides = array<i32>} : memref<1x16x16xf32, #tpu.memory_space<vmem>>, vector<1x16x16xf32>,
    return
  }
  func.func @transform_0(%arg0: i32, %arg1: i32) -> (i32, i32, i32) {
    %c0_i32 = arith.constant 0 : i32
    %c0_i32_0 = arith.constant 0 : i32
    return %arg0, %c0_i32, %arg1 : i32, i32, i32
  }
  func.func @transform_1(%arg0: i32, %arg1: i32) -> (i32, i32, i32) {
    %c0_i32 = arith.constant 0 : i32
    %c0_i32_0 = arith.constant 0 : i32
    return %arg0, %c0_i32, %arg1 : i32, i32, i32
  }
  func.func @transform_2(%arg0: i32, %arg1: i32) -> (i32, i32) {
    %c0_i32 = arith.constant 0 : i32
    %c0_i32_0 = arith.constant 0 : i32
    %c0_i32_1 = arith.constant 0 : i32
    return %c0_i32, %c0_i32_0 : i32, i32
  }
  func.func @transform_3(%arg0: i32, %arg1: i32) -> (i32, i32) {
    %c0_i32 = arith.constant 0 : i32
    %c0_i32_0 = arith.constant 0 : i32
    %c0_i32_1 = arith.constant 0 : i32
    return %c0_i32, %c0_i32_0 : i32, i32
  }
  func.func @transform_4(%arg0: i32, %arg1: i32) -> (i32, i32, i32) {
    %c0_i32 = arith.constant 0 : i32
    %c0_i32_0 = arith.constant 0 : i32
    return %arg0, %c0_i32, %arg1 : i32, i32, i32
  }
}

module attributes {stable_mosaic.version = 11 : i64} {
  func.func @_linear_single_k_kernel(%arg0: i32, %arg1: i32, %arg2: i32, %arg3: memref<1x16x32xf32, #tpu.memory_space<vmem>>, %arg4: memref<1x32x32xf32, #tpu.memory_space<vmem>>, %arg5: memref<1x1x32xf32, #tpu.memory_space<vmem>>, %arg6: memref<1x16x32xf32, #tpu.memory_space<vmem>>) attributes {dimension_semantics = [#tpu.dimension_semantics<parallel>, #tpu.dimension_semantics<parallel>, #tpu.dimension_semantics<parallel>], iteration_bounds = array<i64: 1, 1, 1>, scalar_prefetch = 0 : i64, scratch_operands = 0 : i64, tpu.core_type = #tpu.core_type<tc>, window_params = [{transform_indices = @transform_0, window_bounds = array<i64: 1, 16, 32>}, {transform_indices = @transform_1, window_bounds = array<i64: 1, 32, 32>}, {transform_indices = @transform_2, window_bounds = array<i64: 1, 1, 32>}, {transform_indices = @transform_3, window_bounds = array<i64: 1, 16, 32>}]} {
    %c0 = arith.constant 0 : index
    %c0_0 = arith.constant 0 : index
    %c0_1 = arith.constant 0 : index
    %0 = vector.load %arg3[%c0, %c0_0, %c0_1] : memref<1x16x32xf32, #tpu.memory_space<vmem>>, vector<1x16x32xf32>
    %1 = vector.shape_cast %0 : vector<1x16x32xf32> to vector<16x32xf32>
    %c0_2 = arith.constant 0 : index
    %c0_3 = arith.constant 0 : index
    %c0_4 = arith.constant 0 : index
    %2 = vector.load %arg4[%c0_2, %c0_3, %c0_4] : memref<1x32x32xf32, #tpu.memory_space<vmem>>, vector<1x32x32xf32>
    %3 = vector.shape_cast %2 : vector<1x32x32xf32> to vector<32x32xf32>
    %cst = arith.constant dense<0.000000e+00> : vector<16x32xf32>
    %4 = tpu.matmul %1, %3, %cst {dimension_numbers = #tpu.dot_dimension_numbers<[1], [0], [0], [1], [0, 0, 1, 1], [], []>, precision = #tpu.contract_precision<fp32>} : vector<16x32xf32>, vector<32x32xf32>, vector<16x32xf32> -> vector<16x32xf32>
    %c0_5 = arith.constant 0 : index
    %c0_6 = arith.constant 0 : index
    %c0_7 = arith.constant 0 : index
    %5 = vector.load %arg5[%c0_5, %c0_6, %c0_7] : memref<1x1x32xf32, #tpu.memory_space<vmem>>, vector<1x1x32xf32>
    %6 = vector.shape_cast %5 : vector<1x1x32xf32> to vector<1x32xf32>
    %7 = vector.broadcast %6 : vector<1x32xf32> to vector<16x32xf32>
    %8 = arith.addf %4, %7 : vector<16x32xf32>
    %c0_8 = arith.constant 0 : index
    %c0_9 = arith.constant 0 : index
    %c0_10 = arith.constant 0 : index
    %9 = vector.load %arg6[%c0_8, %c0_9, %c0_10] : memref<1x16x32xf32, #tpu.memory_space<vmem>>, vector<1x16x32xf32>
    %10 = vector.shape_cast %9 : vector<1x16x32xf32> to vector<16x32xf32>
    %11 = vector.shape_cast %8 : vector<16x32xf32> to vector<1x16x32xf32>
    tpu.vector_store %arg6[%c0_8, %c0_9, %c0_10], %11 {strides = array<i32>} : memref<1x16x32xf32, #tpu.memory_space<vmem>>, vector<1x16x32xf32>,
    return
  }
  func.func @transform_0(%arg0: i32, %arg1: i32, %arg2: i32) -> (i32, i32, i32) {
    %c0_i32 = arith.constant 0 : i32
    %c0_i32_0 = arith.constant 0 : i32
    return %arg0, %arg1, %c0_i32 : i32, i32, i32
  }
  func.func @transform_1(%arg0: i32, %arg1: i32, %arg2: i32) -> (i32, i32, i32) {
    %c0_i32 = arith.constant 0 : i32
    %c0_i32_0 = arith.constant 0 : i32
    return %arg0, %c0_i32, %arg2 : i32, i32, i32
  }
  func.func @transform_2(%arg0: i32, %arg1: i32, %arg2: i32) -> (i32, i32, i32) {
    %c0_i32 = arith.constant 0 : i32
    %c0_i32_0 = arith.constant 0 : i32
    return %arg0, %c0_i32, %arg2 : i32, i32, i32
  }
  func.func @transform_3(%arg0: i32, %arg1: i32, %arg2: i32) -> (i32, i32, i32) {
    %c0_i32 = arith.constant 0 : i32
    return %arg0, %arg1, %arg2 : i32, i32, i32
  }
}

</mosaic_0001>

<bundles_post_ra>
// kernel: squeeze.3
= control target key start
LH: loop header
LB: loop body
LE: loop exit
PB: predicated region body
PF: predicated region fallthrough
CT: control target
= control target key end

     0   :  { %s182_s8 = smov 112   ;;  %s183_s9 = smov 120   ;;  %vm3_vm0 = vcmask 64512   ;;  %s265_s0 = inlined_call_operand.vmem [shape: f32[1,16,32], index: 0, kind: input, shape index: {}]   ;;  %s266_s1 = inlined_call_operand.vmem [shape: f32[2,8,4,8], index: 1, kind: output, shape index: {}]  }
   0x1   :  { %v30_v0 = vld [vmem:[%s265_s0] sm:$0xff]   ;;  %s184_s10 = smov 104   ;;  %v162_v1 = vld [vmem:[%s265_s0 + $0x8] sm:$0xff]  }
   0x2   :  { %31 = vrot.lane.b32.xlu1 %v30_v0, %s182_s8  ;;  %14 = vrot.lane.b32.xlu0 %v30_v0, %s183_s9  ;;  %5 = vst.msk [vmem:[#allocation0] ss:$8 sm:$0xf0] %vm3_vm0, %v30_v0  }
   0x3   :  { %48 = vrot.lane.b32.xlu2 %v30_v0, %s184_s10  ;;  %4 = vst.msk [vmem:[#allocation0] ss:$8 sm:$0xf] %vm3_vm0, %v30_v0  }
   0x4   :  { %10 = vst.msk [vmem:[#allocation0 + $0x40] ss:$8 sm:$0xf] %vm3_vm0, %v162_v1  }
   0x5   :  { %12 = vst.msk [vmem:[#allocation0 + $0x40] ss:$8 sm:$0xf0] %vm3_vm0, %v162_v1  }
   0xa   :  { %40 = vrot.lane.b32.xlu1 %v162_v1, %s182_s8  ;;  %23 = vrot.lane.b32.xlu0 %v162_v1, %s183_s9 }
   0xb   :  { %57 = vrot.lane.b32.xlu2 %v162_v1, %s184_s10 }
  0x5d   :  { %v49_v2 = vpop.permute.xlu2 %48  }
  0x5e   :  { %52 = vst.msk [vmem:[#allocation0 + $0x3] ss:$8 sm:$0xf] %vm3_vm0, %v49_v2  }
  0x5f   :  { %54 = vst.msk [vmem:[#allocation0 + $0x3] ss:$8 sm:$0xf0] %vm3_vm0, %v49_v2  }
  0x65   :  { %v58_v3 = vpop.permute.xlu2 %57  }
  0x66   :  { %61 = vst.msk [vmem:[#allocation0 + $0x43] ss:$8 sm:$0xf] %vm3_vm0, %v58_v3  }
  0x67   :  { %63 = vst.msk [vmem:[#allocation0 + $0x43] ss:$8 sm:$0xf0] %vm3_vm0, %v58_v3  }
  0x74   :  { %v32_v4 = vpop.permute.xlu1 %31   ;;  %v15_v5 = vpop.permute.xlu0 %14  }
  0x75   :  { %35 = vst.msk [vmem:[#allocation0 + $0x2] ss:$8 sm:$0xf] %vm3_vm0, %v32_v4  }
  0x76   :  { %37 = vst.msk [vmem:[#allocation0 + $0x2] ss:$8 sm:$0xf0] %vm3_vm0, %v32_v4  }
  0x77   :  { %18 = vst.msk [vmem:[#allocation0 + $0x1] ss:$8 sm:$0xf] %vm3_vm0, %v15_v5  }
  0x78   :  { %20 = vst.msk [vmem:[#allocation0 + $0x1] ss:$8 sm:$0xf0] %vm3_vm0, %v15_v5  }
  0x7c   :  { %v41_v6 = vpop.permute.xlu1 %40   ;;  %v24_v7 = vpop.permute.xlu0 %23  }
  0x7d   :  { %44 = vst.msk [vmem:[#allocation0 + $0x42] ss:$8 sm:$0xf] %vm3_vm0, %v41_v6  }
  0x7e   :  { %v66_v8 = vld [vmem:[#allocation0] sm:$0xf]  ;;  %v71_v9 = vld [vmem:[#allocation0 + $0x8] sm:$0xf]  ;;  %v77_v10 = vld [vmem:[#allocation0 + $0x10] sm:$0xf] }
  0x7f   :  { %69 = vst [vmem:[%s266_s1] sm:$0xf] %v66_v8  ;;  %v83_v11 = vld [vmem:[#allocation0 + $0x18] sm:$0xf]  ;;  %v89_v12 = vld [vmem:[#allocation0 + $0x20] sm:$0xf] }
  0x80   :  { %164 = vst [vmem:[%s266_s1 + $0x4] sm:$0xf] %v71_v9  ;;  %v95_v13 = vld [vmem:[#allocation0 + $0x28] sm:$0xf]  ;;  %v101_v14 = vld [vmem:[#allocation0 + $0x30] sm:$0xf] }
  0x81   :  { %165 = vst [vmem:[%s266_s1 + $0x8] sm:$0xf] %v77_v10  ;;  %v107_v15 = vld [vmem:[#allocation0 + $0x38] sm:$0xf] }
  0x82   :  { %166 = vst [vmem:[%s266_s1 + $0xc] sm:$0xf] %v83_v11 }
  0x83   :  { %167 = vst [vmem:[%s266_s1 + $0x10] sm:$0xf] %v89_v12 }
  0x84   :  { %168 = vst [vmem:[%s266_s1 + $0x14] sm:$0xf] %v95_v13 }
  0x85   :  { %169 = vst [vmem:[%s266_s1 + $0x18] sm:$0xf] %v101_v14 }
  0x86   :  { %170 = vst [vmem:[%s266_s1 + $0x1c] sm:$0xf] %v107_v15 }
  0x87   :  { %46 = vst.msk [vmem:[#allocation0 + $0x42] ss:$8 sm:$0xf0] %vm3_vm0, %v41_v6  }
  0x88   :  { %27 = vst.msk [vmem:[#allocation0 + $0x41] ss:$8 sm:$0xf] %vm3_vm0, %v24_v7  }
  0x89   :  { %29 = vst.msk [vmem:[#allocation0 + $0x41] ss:$8 sm:$0xf0] %vm3_vm0, %v24_v7  }
  0x8f   :  { %v113_v16 = vld [vmem:[#allocation0 + $0x40] sm:$0xf]  ;;  %v119_v17 = vld [vmem:[#allocation0 + $0x48] sm:$0xf]  ;;  %v125_v18 = vld [vmem:[#allocation0 + $0x50] sm:$0xf] }
  0x90   :  { %171 = vst [vmem:[%s266_s1 + $0x20] sm:$0xf] %v113_v16  ;;  %v131_v19 = vld [vmem:[#allocation0 + $0x58] sm:$0xf]  ;;  %v137_v20 = vld [vmem:[#allocation0 + $0x60] sm:$0xf] }
  0x91   :  { %172 = vst [vmem:[%s266_s1 + $0x24] sm:$0xf] %v119_v17  ;;  %v143_v21 = vld [vmem:[#allocation0 + $0x68] sm:$0xf]  ;;  %v149_v22 = vld [vmem:[#allocation0 + $0x70] sm:$0xf] }
  0x92   :  { %173 = vst [vmem:[%s266_s1 + $0x28] sm:$0xf] %v125_v18  ;;  %v155_v23 = vld [vmem:[#allocation0 + $0x78] sm:$0xf] }
  0x93   :  { %174 = vst [vmem:[%s266_s1 + $0x2c] sm:$0xf] %v131_v19 }
  0x94   :  { %175 = vst [vmem:[%s266_s1 + $0x30] sm:$0xf] %v137_v20 }
  0x95   :  { %176 = vst [vmem:[%s266_s1 + $0x34] sm:$0xf] %v143_v21 }
  0x96   :  { %177 = vst [vmem:[%s266_s1 + $0x38] sm:$0xf] %v149_v22 }
  0x97   :  { %178 = vst [vmem:[%s266_s1 + $0x3c] sm:$0xf] %v155_v23 }

// kernel: multiwavelet_cross_forward.7
= control target key start
LH: loop header
LB: loop body
LE: loop exit
PB: predicated region body
PF: predicated region fallthrough
CT: control target
= control target key end

     0   :  { %s810_s15 = smov 0   ;;  %s812_s16 = smov 0   ;;  %s872_s0 = inlined_call_operand.vmem [shape: f32[2,8,4], index: 0, kind: input, shape index: {}, may-alias: {0,1}]   ;;  %s873_s1 = inlined_call_operand.vmem [shape: f32[2,8,4], index: 1, kind: input, shape index: {}, may-alias: {0,1}]   ;;  %s874_s2 = inlined_call_operand.vmem [shape: f32[16,8], index: 2, kind: input, shape index: {}]   ;;  %s875_s3 = inlined_call_operand.vmem [shape: f32[16,8], index: 3, kind: input, shape index: {}]   ;;  %s876_s4 = inlined_call_operand.vmem [shape: f32[2,16,4], index: 4, kind: output, shape index: {}]  }
   0x1   :  { %s814_s17 = smov 0  }
   0x2 LB: > { %s26_s18 = sadd.s32 1, %s779_s16  ;;  %p729_p0 = scmp.ge.s32.totalorder %s783_s17, 1  ;;  %s783_s17 = sphi %s814_s17, %s14_s17   ;;  %s779_s16 = sphi %s812_s16, %s878_s16   ;;  %s775_s15 = sphi %s810_s15, %s877_s15  }
   0x3   : > { %p28_p1 = scmp.ge.s32.totalorder %s26_s18, 2  ;;  %p194_p2 = scmp.lt.s32.totalorder %s783_s17, 3 }
   0x5   : > { %s880_s18 = smov (%p28_p1, %s26_s18), 0  ;;  %p195_p3 = pnand %p729_p0, %p194_p2 }
   0x6   : > { %p232_p4 = scmp.lt.s32.totalorder (!%p195_p3), %s775_s15, 1 }
   0x7   : > { %198 = sbr.rel (%p195_p3) target bundleno = 200 (0xc8), region = 36 }
   0xc   : > { %v257_v0 = vld [vmem:[%s875_s3] sm:$0xff]  ;;  %vm260_vm0 = vcmask 64512   ;;  %v258_v1 = vld [vmem:[%s875_s3 + $0x8] sm:$0xff]  ;;  %s882_s15 = smov (!%p232_p4, %s775_s15), 1  ;;  %vm627_vm1 = vcmask 31744  }
   0xd   : > { %v262_v2 = vsel %vm260_vm0, %v257_v0, 0  ;;  %v265_v3 = vsel %vm260_vm0, %v258_v1, 0  ;;  %v254_v6 = vld [vmem:[%s874_s2] sm:$0xff]  ;;  %s730_s25 = sshll.u32 %s882_s15, 3  ;;  %v255_v21 = vld [vmem:[%s874_s2 + $0x8] sm:$0xff]  ;;  %s736_s8 = sshll.u32 %s882_s15, 4 }
   0xe   : > { %v284_v4 = vand.u32 4294901760, %v262_v2  ;;  %v838_v5 = vand.u32 4294901760, %v265_v3  ;;  %s245_s28 = scalar_lea.vmem %s873_s1, %s730_s25  ;;  %s238_s5 = scalar_lea.vmem %s872_s0, %s730_s25  ;;  %v445_v9 = vsel %vm260_vm0, %v254_v6, 0  ;;  %v448_v28 = vsel %vm260_vm0, %v255_v21, 0 }
   0xf   : > { %v259_v10 = vld [vmem:[%s245_s28] sm:$0xff]  ;;  %v467_v17 = vand.u32 4294901760, %v445_v9  ;;  %v475_v33 = vand.u32 4294901760, %v448_v28  ;;  %s253_s11 = scalar_lea.vmem %s876_s4, %s736_s8 }
  0x10   : > { %v285_v7 = vsub.f32 %v262_v2, %v284_v4  ;;  %v293_v8 = vsub.f32 %v265_v3, %v838_v5  ;;  %v256_v12 = vld [vmem:[%s238_s5] sm:$0xff]  ;;  %v282_v13 = vand.u32 4294901760, %v259_v10 }
  0x11   : > { %v465_v14 = vand.u32 4294901760, %v256_v12  ;;  %v468_v25 = vsub.f32 %v445_v9, %v467_v17  ;;  %v476_v35 = vsub.f32 %v448_v28, %v475_v33 }
  0x12   : > { %v286_v11 = vand.u32 4294901760, %v285_v7  ;;  %v294_v16 = vand.u32 4294901760, %v293_v8  ;;  %283 = vmatpush.msra.mxu0 %v282_v13  ;;  %v317_v18 = vsub.f32 %v259_v10, %v282_v13  ;;  %376 = vmatpush.msra.mxu3 %v282_v13 }
  0x13   : > { %v500_v19 = vsub.f32 %v256_v12, %v465_v14  ;;  %v469_v32 = vand.u32 4294901760, %v468_v25  ;;  %v477_v37 = vand.u32 4294901760, %v476_v35 }
  0x14   : > { %v287_v15 = vsub.f32 %v285_v7, %v286_v11  ;;  %380 = vmatmul.f32.vlgmr.msra.gmra.mxu3 %v286_v11  ;;  %348 = vmatpush.msra.mxu2 %v317_v18  ;;  %v318_v22 = vand.u32 4294901760, %v317_v18  ;;  %v295_v24 = vsub.f32 %v293_v8, %v294_v16 }
  0x15   : > { %v501_v23 = vand.u32 4294901760, %v500_v19  ;;  %351 = vmatmul.f32.vlgmr.msra.gmra.mxu2 %v285_v7  ;;  %v470_v34 = vsub.f32 %v468_v25, %v469_v32  ;;  %v478_v38 = vsub.f32 %v476_v35, %v477_v37 }
  0x16   : > { %v288_v20 = vand.u32 4294901760, %v287_v15  ;;  %466 = vmatpush.msrb.mxu2 %v465_v14  ;;  %v319_v26 = vsub.f32 %v317_v18, %v318_v22  ;;  %408 = vmatpush.msrb.mxu0 %v318_v22  ;;  %v296_v31 = vand.u32 4294901760, %v295_v24 }
  0x17   : > { %v502_v27 = vsub.f32 %v500_v19, %v501_v23  ;;  %v471_v36 = vand.u32 4294901760, %v470_v34  ;;  %v479_v39 = vand.u32 4294901760, %v478_v38 }
  0x18   : > { %289 = vmatmul.f32.vlgmr.msra.gmra.mxu0 %v288_v20  ;;  %591 = vmatpush.msra.mxu2 %v501_v23  ;;  %v320_v29 = vand.u32 4294901760, %v319_v26 }
  0x19   : > { %531 = vmatpush.msra.mxu0 %v500_v19  ;;  %v503_v30 = vand.u32 4294901760, %v502_v27 }
  0x1a   : > { %321 = vmatpush.msra.mxu1 %v320_v29 }
  0x1b   : > { %504 = vmatpush.msrb.mxu3 %v503_v30  ;;  %323 = vmatmul.f32.vlgmr.msra.gmra.mxu1 %v284_v4 }
  0x1c   : > { %386 = vmatmul.f32.gmra.mxu3 %v294_v16  ;;  %434 = vmatpush.msrb.mxu1 %v282_v13 }
  0x1d   : > { %617 = vmatpush.msra.mxu3 %v465_v14  ;;  %356 = vmatmul.f32.gmra.mxu2 %v293_v8 }
  0x1e   : > { %559 = vmatpush.msra.mxu1 %v465_v14 }
  0x20   : > { %297 = vmatmul.f32.gmra.mxu0 %v296_v31 }
  0x23   : > { %327 = vmatmul.f32.gmra.mxu1 %v838_v5 }
  0x24   : > { %506 = vmatmul.f32.vlgmr.msrb.gmra.mxu3 %v467_v17 }
  0x25   : > { %472 = vmatmul.f32.vlgmr.msrb.gmra.mxu2 %v471_v36 }
  0x28   : > { %410 = vmatmul.f32.vlgmr.msrb.gmra.mxu0 %v284_v4 }
  0x2b   : > { %436 = vmatmul.f32.vlgmr.msrb.gmra.mxu1 %v284_v4 }
  0x2c   : > { %510 = vmatmul.f32.gmra.mxu3 %v475_v33 }
  0x2d   : > { %480 = vmatmul.f32.gmra.mxu2 %v479_v39 }
  0x30   : > { %414 = vmatmul.f32.gmra.mxu0 %v838_v5 }
  0x33   : > { %440 = vmatmul.f32.gmra.mxu1 %v838_v5 }
  0x34   : > { %619 = vmatmul.f32.vlgmr.msra.gmra.mxu3 %v467_v17 }
  0x35   : > { %593 = vmatmul.f32.vlgmr.msra.gmra.mxu2 %v467_v17 }
  0x38   : > { %534 = vmatmul.f32.vlgmr.msra.gmra.mxu0 %v468_v25 }
  0x3b   : > { %563 = vmatmul.f32.vlgmr.msra.gmra.mxu1 %v469_v32 }
  0x3c   : > { %623 = vmatmul.f32.gmra.mxu3 %v475_v33 }
  0x3d   : > { %597 = vmatmul.f32.gmra.mxu2 %v475_v33 }
  0x40   : > { %539 = vmatmul.f32.gmra.mxu0 %v476_v35 }
  0x43   : > { %569 = vmatmul.f32.gmra.mxu1 %v477_v37 }
  0x95   : > { %v290_v40 = vpop.f32.mrf.mxu0 }
  0x97   : > { %v381_v41 = vpop.f32.mrf.mxu3 }
  0x98   : > { %v324_v42 = vpop.f32.mrf.mxu1  ;;  %v352_v43 = vpop.f32.mrf.mxu2 }
  0x99   : > { %v325_v48 = vadd.f32 %v324_v42, %v290_v40 }
  0x9b   : > { %v353_v50 = vadd.f32 %v352_v43, %v325_v48 }
  0x9d   : > { %v298_v44 = vpop.f32.mrf.mxu0  ;;  %v382_v54 = vadd.f32 %v381_v41, %v353_v50 }
  0x9f   : > { %v387_v45 = vpop.f32.mrf.mxu3 }
  0xa0   : > { %v328_v46 = vpop.f32.mrf.mxu1  ;;  %v357_v47 = vpop.f32.mrf.mxu2 }
  0xa1   : > { %v329_v55 = vadd.f32 %v328_v46, %v298_v44 }
  0xa3   : > { %v358_v58 = vadd.f32 %v357_v47, %v329_v55 }
  0xa5   : > { %v411_v49 = vpop.f32.mrf.mxu0  ;;  %v388_v63 = vadd.f32 %v387_v45, %v358_v58 }
  0xa6   : > { %v412_v57 = vadd.f32 %v411_v49, %v382_v54 }
  0xa7   : > { %v507_v51 = vpop.f32.mrf.mxu3 }
  0xa8   : > { %v437_v52 = vpop.f32.mrf.mxu1  ;;  %v473_v53 = vpop.f32.mrf.mxu2 }
  0xa9   : > { %v438_v59 = vadd.f32 %v437_v52, %v412_v57 }
  0xab   : > { %v474_v0 = vadd.f32 %v473_v53, %v438_v59 }
  0xad   : > { %v415_v56 = vpop.f32.mrf.mxu0  ;;  %v508_v3 = vadd.f32 %v507_v51, %v474_v0 }
  0xae   : > { %v416_v2 = vadd.f32 %v415_v56, %v388_v63 }
  0xaf   : > { %v511_v60 = vpop.f32.mrf.mxu3 }
  0xb0   : > { %v441_v61 = vpop.f32.mrf.mxu1  ;;  %v481_v62 = vpop.f32.mrf.mxu2 }
  0xb1   : > { %v442_v4 = vadd.f32 %v441_v61, %v416_v2 }
  0xb3   : > { %v482_v9 = vadd.f32 %v481_v62, %v442_v4 }
  0xb5   : > { %v535_v1 = vpop.f32.mrf.mxu0  ;;  %v512_v13 = vadd.f32 %v511_v60, %v482_v9 }
  0xb6   : > { %v536_v5 = vadd.f32 %v535_v1, %v508_v3 }
  0xb7   : > { %v620_v6 = vpop.f32.mrf.mxu3 }
  0xb8   : > { %v564_v7 = vpop.f32.mrf.mxu1  ;;  %v594_v8 = vpop.f32.mrf.mxu2 }
  0xb9   : > { %v565_v10 = vadd.f32 %v564_v7, %v536_v5 }
  0xbb   : > { %v595_v11 = vadd.f32 %v594_v8, %v565_v10 }
  0xbd   : > { %v540_v12 = vpop.f32.mrf.mxu0  ;;  %v621_v14 = vadd.f32 %v620_v6, %v595_v11 }
  0xbe   : > { %v541_v15 = vadd.f32 %v540_v12, %v512_v13 }
  0xbf   : > { %628 = vst.msk [vmem:[%s253_s11] sm:$0xff] %vm627_vm1, %v621_v14  ;;  %v624_v19 = vpop.f32.mrf.mxu3 }
  0xc0   : > { %v570_v16 = vpop.f32.mrf.mxu1  ;;  %v598_v17 = vpop.f32.mrf.mxu2 }
  0xc1   : > { %v571_v18 = vadd.f32 %v570_v16, %v541_v15 }
  0xc3   : > { %v599_v20 = vadd.f32 %v598_v17, %v571_v18 }
  0xc5   : > { %v625_v21 = vadd.f32 %v624_v19, %v599_v20 }
  0xc7   : > { %629 = vst.msk [vmem:[%s253_s11 + $0x8] sm:$0xff] %vm627_vm1, %v625_v21 }
  0xc8 PF: > { %s14_s17 = sadd.s32 1, %s783_s17   ;;  %s877_s15 = smov %s779_s16 }
  0xc9   : > { %p11_p5 = scmp.ge.s32.totalorder %s14_s17, 4   ;;  %s878_s16 = smov %s880_s18 }
  0xcb   :  { %13 = sbr.rel (!%p11_p5) target bundleno = 2 (0x2), region = 69 }

// kernel: multiwavelet_cross_forward.8
= control target key start
LH: loop header
LB: loop body
LE: loop exit
PB: predicated region body
PF: predicated region fallthrough
CT: control target
= control target key end

     0   :  { %s739_s12 = smov 0   ;;  %s741_s13 = smov 0   ;;  %s830_s0 = inlined_call_operand.vmem [shape: f32[3,16,32], index: 0, kind: input, shape index: {}]   ;;  %s831_s1 = inlined_call_operand.vmem [shape: f32[3,32,32], index: 1, kind: input, shape index: {}]   ;;  %s832_s2 = inlined_call_operand.vmem [shape: f32[3,1,32], index: 2, kind: input, shape index: {}]   ;;  %s833_s3 = inlined_call_operand.vmem [shape: f32[3,16,32], index: 3, kind: output, shape index: {}]  }
   0x1   :  { %s743_s14 = smov 0  }
   0x2 LB: > { %s32_s15 = sadd.s32 1, %s713_s13  ;;  %p650_p0 = scmp.ge.s32.totalorder %s717_s14, 1  ;;  %s717_s14 = sphi %s743_s14, %s13_s14   ;;  %s713_s13 = sphi %s741_s13, %s835_s13   ;;  %s709_s12 = sphi %s739_s12, %s834_s12  }
   0x3   : > { %p34_p1 = scmp.ge.s32.totalorder %s32_s15, 3  ;;  %p195_p2 = scmp.lt.s32.totalorder %s717_s14, 4 }
   0x5   : > { %s837_s15 = smov (%p34_p1, %s32_s15), 0  ;;  %p196_p3 = pnand %p650_p0, %p195_p2 }
   0x6   : > { %p245_p4 = scmp.lt.s32.totalorder (!%p196_p3), %s709_s12, 2 }
   0x7   : > { %199 = sbr.rel (%p196_p3) target bundleno = 189 (0xbd), region = 32 }
   0xc   : > { %s839_s12 = smov (!%p245_p4, %s709_s12), 2  ;;  %vm291_vm0 = vcmask 261120  }
   0xd   : > { %s660_s16 = sshll.u32 %s839_s12, 5  ;;  %s659_s17 = sshll.u32 %s839_s12, 4 }
   0xe   : > { %s261_s20 = scalar_lea.vmem %s831_s1, %s660_s16  ;;  %s252_s23 = scalar_lea.vmem %s830_s0, %s659_s17 }
   0xf   : > { %v286_v0 = vld [vmem:[%s261_s20 + $0x18] sm:$0xff]  ;;  %v285_v1 = vld [vmem:[%s261_s20 + $0x10] sm:$0xff]  ;;  %v284_v2 = vld [vmem:[%s261_s20 + $0x8] sm:$0xff]  ;;  %s267_s26 = scalar_lea.vmem %s832_s2, %s839_s12  ;;  %s279_s4 = scalar_lea.vmem %s833_s3, %s659_s17 }
  0x10   : > { %v769_v3 = vand.u32 4294901760, %v286_v0  ;;  %v771_v4 = vand.u32 4294901760, %v285_v1  ;;  %v773_v5 = vand.u32 4294901760, %v284_v2  ;;  %v283_v6 = vld [vmem:[%s261_s20] sm:$0xff]  ;;  %v282_v7 = vld [vmem:[%s252_s23 + $0x8] sm:$0xff] }
  0x11   : > { %v281_v8 = vld [vmem:[%s252_s23] sm:$0xff]  ;;  %v779_v9 = vand.u32 4294901760, %v283_v6  ;;  %v296_v10 = vsel %vm291_vm0, %v282_v7, 0 }
  0x12   : > { %v293_v11 = vsel %vm291_vm0, %v281_v8, 0  ;;  %662 = vmatpush.msra.mxu2 %v769_v3  ;;  %v348_v12 = vsub.f32 %v286_v0, %v769_v3  ;;  %v785_v13 = vand.u32 4294901760, %v296_v10  ;;  %v354_v14 = vsub.f32 %v285_v1, %v771_v4  ;;  %311 = vmatpush.msra.mxu0 %v769_v3  ;;  %v694_v39 = vld [vmem:[%s267_s26] ss:$0 sm:$0xff] }
  0x13   : > { %v360_v15 = vsub.f32 %v284_v2, %v773_v5  ;;  %v366_v16 = vsub.f32 %v283_v6, %v779_v9  ;;  %v318_v17 = vand.u32 4294901760, %v293_v11 }
  0x14   : > { %663 = vmatpush.msra.mxu2 %v771_v4  ;;  %v349_v18 = vand.u32 4294901760, %v348_v12  ;;  %v327_v19 = vsub.f32 %v296_v10, %v785_v13  ;;  %v355_v20 = vand.u32 4294901760, %v354_v14  ;;  %313 = vmatpush.msra.mxu0 %v771_v4 }
  0x15   : > { %v361_v21 = vand.u32 4294901760, %v360_v15  ;;  %v367_v22 = vand.u32 4294901760, %v366_v16  ;;  %v319_v23 = vsub.f32 %v293_v11, %v318_v17 }
  0x16   : > { %664 = vmatpush.msra.mxu2 %v773_v5  ;;  %v350_v24 = vsub.f32 %v348_v12, %v349_v18  ;;  %v328_v25 = vand.u32 4294901760, %v327_v19  ;;  %v356_v26 = vsub.f32 %v354_v14, %v355_v20  ;;  %315 = vmatpush.msra.mxu0 %v773_v5 }
  0x17   : > { %v362_v27 = vsub.f32 %v360_v15, %v361_v21  ;;  %v320_v28 = vand.u32 4294901760, %v319_v23  ;;  %v368_v32 = vsub.f32 %v366_v16, %v367_v22 }
  0x18   : > { %665 = vmatpush.msra.mxu2 %v779_v9  ;;  %v351_v29 = vand.u32 4294901760, %v350_v24  ;;  %v329_v30 = vsub.f32 %v327_v19, %v328_v25  ;;  %v357_v31 = vand.u32 4294901760, %v356_v26  ;;  %317 = vmatpush.msra.mxu0 %v779_v9 }
  0x19   : > { %v321_v33 = vsub.f32 %v319_v23, %v320_v28  ;;  %v363_v35 = vand.u32 4294901760, %v362_v27  ;;  %v369_v37 = vand.u32 4294901760, %v368_v32 }
  0x1a   : > { %394 = vmatpush.msrb.mxu2 %v348_v12  ;;  %463 = vmatpush.msrb.mxu0 %v349_v18  ;;  %v330_v34 = vand.u32 4294901760, %v329_v30 }
  0x1b   : > { %666 = vmatpush.msra.mxu3 %v351_v29  ;;  %352 = vmatpush.msra.mxu1 %v351_v29  ;;  %v322_v36 = vand.u32 4294901760, %v321_v33 }
  0x1c   : > { %397 = vmatpush.msrb.mxu2 %v354_v14  ;;  %467 = vmatpush.msrb.mxu0 %v355_v20 }
  0x1d   : > { %331 = vmatmul.f32.vlgmr.msra.gmra.mxu2 %v330_v34  ;;  %667 = vmatpush.msra.mxu3 %v357_v31 }
  0x1e   : > { %400 = vmatpush.msrb.mxu2 %v360_v15  ;;  %358 = vmatpush.msra.mxu1 %v357_v31 }
  0x1f   : > { %668 = vmatpush.msra.mxu3 %v363_v35  ;;  %323 = vmatmul.f32.vlgmr.msra.gmra.mxu0 %v322_v36 }
  0x20   : > { %403 = vmatpush.msrb.mxu2 %v366_v16  ;;  %364 = vmatpush.msra.mxu1 %v363_v35 }
  0x21   : > { %669 = vmatpush.msra.mxu3 %v369_v37  ;;  %471 = vmatpush.msrb.mxu0 %v361_v21 }
  0x22   : > { %376 = vmatmul.f32.vlgmr.msra.gmra.mxu3 %v785_v13  ;;  %370 = vmatpush.msra.mxu1 %v369_v37 }
  0x23   : > { %428 = vmatpush.msrb.mxu3 %v769_v3  ;;  %372 = vmatmul.f32.vlgmr.msra.gmra.mxu1 %v318_v17 }
  0x24   : > { %498 = vmatpush.msrb.mxu1 %v769_v3  ;;  %475 = vmatpush.msrb.mxu0 %v367_v22 }
  0x25   : > { %406 = vmatmul.f32.vlgmr.msrb.gmra.mxu2 %v319_v23  ;;  %430 = vmatpush.msrb.mxu3 %v771_v4 }
  0x26   : > { %500 = vmatpush.msrb.mxu1 %v771_v4 }
  0x27   : > { %432 = vmatpush.msrb.mxu3 %v773_v5  ;;  %477 = vmatmul.f32.vlgmr.msrb.gmra.mxu0 %v318_v17 }
  0x28   : > { %502 = vmatpush.msrb.mxu1 %v773_v5 }
  0x29   : > { %434 = vmatpush.msrb.mxu3 %v779_v9 }
  0x2a   : > { %438 = vmatmul.f32.vlgmr.msrb.gmra.mxu3 %v320_v28  ;;  %504 = vmatpush.msrb.mxu1 %v779_v9 }
  0x2b   : > { %506 = vmatmul.f32.vlgmr.msrb.gmra.mxu1 %v318_v17 }
  0x2d   : > { %411 = vmatmul.f32.gmra.mxu2 %v327_v19 }
  0x2f   : > { %481 = vmatmul.f32.gmra.mxu0 %v785_v13 }
  0x32   : > { %444 = vmatmul.f32.gmra.mxu3 %v328_v25 }
  0x33   : > { %510 = vmatmul.f32.gmra.mxu1 %v785_v13 }
  0x9c   : > { %v324_v38 = vpop.f32.mrf.mxu0 }
  0x9d   : > { %v325_v41 = vadd.f32 %v694_v39, %v324_v38 }
  0xa0   : > { %v332_v40 = vpop.f32.mrf.mxu2  ;;  %v373_v42 = vpop.f32.mrf.mxu1 }
  0xa1   : > { %v374_v44 = vadd.f32 %v373_v42, %v325_v41  ;;  %v333_v50 = vadd.f32 %v694_v39, %v332_v40 }
  0xa4   : > { %v478_v47 = vpop.f32.mrf.mxu0 }
  0xa5   : > { %v377_v43 = vpop.f32.mrf.mxu3 }
  0xa6   : > { %v378_v54 = vadd.f32 %v377_v43, %v333_v50 }
  0xa8   : > { %v407_v45 = vpop.f32.mrf.mxu2  ;;  %v507_v49 = vpop.f32.mrf.mxu1 }
  0xa9   : > { %v408_v46 = vadd.f32 %v407_v45, %v374_v44 }
  0xac   : > { %v482_v58 = vpop.f32.mrf.mxu0 }
  0xad   : > { %v439_v48 = vpop.f32.mrf.mxu3 }
  0xae   : > { %v440_v51 = vadd.f32 %v439_v48, %v408_v46 }
  0xb0   : > { %v479_v52 = vadd.f32 %v478_v47, %v440_v51  ;;  %v412_v53 = vpop.f32.mrf.mxu2  ;;  %v511_v60 = vpop.f32.mrf.mxu1 }
  0xb1   : > { %v413_v56 = vadd.f32 %v412_v53, %v378_v54 }
  0xb2   : > { %v508_v55 = vadd.f32 %v507_v49, %v479_v52 }
  0xb4   : > { %514 = vst.msk [vmem:[%s279_s4] sm:$0xff] %vm291_vm0, %v508_v55 }
  0xb5   : > { %v445_v57 = vpop.f32.mrf.mxu3 }
  0xb6   : > { %v446_v59 = vadd.f32 %v445_v57, %v413_v56 }
  0xb8   : > { %v483_v61 = vadd.f32 %v482_v58, %v446_v59 }
  0xba   : > { %v512_v62 = vadd.f32 %v511_v60, %v483_v61 }
  0xbc   : > { %515 = vst.msk [vmem:[%s279_s4 + $0x8] sm:$0xff] %vm291_vm0, %v512_v62 }
  0xbd PF: > { %s13_s14 = sadd.s32 1, %s717_s14   ;;  %s834_s12 = smov %s713_s13 }
  0xbe   : > { %p10_p5 = scmp.ge.s32.totalorder %s13_s14, 5   ;;  %s835_s13 = smov %s837_s15 }
  0xc0   :  { %12 = sbr.rel (!%p10_p5) target bundleno = 2 (0x2), region = 68 }

// kernel: multiwavelet_cross_forward.9
= control target key start
LH: loop header
LB: loop body
LE: loop exit
PB: predicated region body
PF: predicated region fallthrough
CT: control target
= control target key end

     0   :  { %s810_s15 = smov 0   ;;  %s812_s16 = smov 0   ;;  %s872_s0 = inlined_call_operand.vmem [shape: f32[6,8,16], index: 0, kind: input, shape index: {}]   ;;  %s873_s1 = inlined_call_operand.vmem [shape: f32[6,8,16], index: 1, kind: input, shape index: {}]   ;;  %s874_s2 = inlined_call_operand.vmem [shape: f32[16,8], index: 2, kind: input, shape index: {}]   ;;  %s875_s3 = inlined_call_operand.vmem [shape: f32[16,8], index: 3, kind: input, shape index: {}]   ;;  %s876_s4 = inlined_call_operand.vmem [shape: f32[6,16,16], index: 4, kind: output, shape index: {}]  }
   0x1   :  { %s814_s17 = smov 0  }
   0x2 LB: > { %s26_s18 = sadd.s32 1, %s779_s16  ;;  %p729_p0 = scmp.ge.s32.totalorder %s783_s17, 1  ;;  %s783_s17 = sphi %s814_s17, %s14_s17   ;;  %s779_s16 = sphi %s812_s16, %s878_s16   ;;  %s775_s15 = sphi %s810_s15, %s877_s15  }
   0x3   : > { %p28_p1 = scmp.ge.s32.totalorder %s26_s18, 6  ;;  %p194_p2 = scmp.lt.s32.totalorder %s783_s17, 7 }
   0x5   : > { %s880_s18 = smov (%p28_p1, %s26_s18), 0  ;;  %p195_p3 = pnand %p729_p0, %p194_p2 }
   0x6   : > { %p232_p4 = scmp.lt.s32.totalorder (!%p195_p3), %s775_s15, 5 }
   0x7   : > { %198 = sbr.rel (%p195_p3) target bundleno = 200 (0xc8), region = 36 }
   0xc   : > { %v257_v0 = vld [vmem:[%s875_s3] sm:$0xff]  ;;  %vm260_vm0 = vcmask 64512   ;;  %v258_v1 = vld [vmem:[%s875_s3 + $0x8] sm:$0xff]  ;;  %s882_s15 = smov (!%p232_p4, %s775_s15), 5  ;;  %vm627_vm1 = vcmask 130048  }
   0xd   : > { %v262_v2 = vsel %vm260_vm0, %v257_v0, 0  ;;  %v265_v3 = vsel %vm260_vm0, %v258_v1, 0  ;;  %v254_v6 = vld [vmem:[%s874_s2] sm:$0xff]  ;;  %s730_s25 = sshll.u32 %s882_s15, 3  ;;  %v255_v21 = vld [vmem:[%s874_s2 + $0x8] sm:$0xff]  ;;  %s736_s8 = sshll.u32 %s882_s15, 4 }
   0xe   : > { %v284_v4 = vand.u32 4294901760, %v262_v2  ;;  %v838_v5 = vand.u32 4294901760, %v265_v3  ;;  %s245_s28 = scalar_lea.vmem %s873_s1, %s730_s25  ;;  %s238_s5 = scalar_lea.vmem %s872_s0, %s730_s25  ;;  %v445_v9 = vsel %vm260_vm0, %v254_v6, 0  ;;  %v448_v28 = vsel %vm260_vm0, %v255_v21, 0 }
   0xf   : > { %v259_v10 = vld [vmem:[%s245_s28] sm:$0xff]  ;;  %v467_v17 = vand.u32 4294901760, %v445_v9  ;;  %v475_v33 = vand.u32 4294901760, %v448_v28  ;;  %s253_s11 = scalar_lea.vmem %s876_s4, %s736_s8 }
  0x10   : > { %v285_v7 = vsub.f32 %v262_v2, %v284_v4  ;;  %v293_v8 = vsub.f32 %v265_v3, %v838_v5  ;;  %v256_v12 = vld [vmem:[%s238_s5] sm:$0xff]  ;;  %v282_v13 = vand.u32 4294901760, %v259_v10 }
  0x11   : > { %v465_v14 = vand.u32 4294901760, %v256_v12  ;;  %v468_v25 = vsub.f32 %v445_v9, %v467_v17  ;;  %v476_v35 = vsub.f32 %v448_v28, %v475_v33 }
  0x12   : > { %v286_v11 = vand.u32 4294901760, %v285_v7  ;;  %v294_v16 = vand.u32 4294901760, %v293_v8  ;;  %283 = vmatpush.msra.mxu0 %v282_v13  ;;  %v317_v18 = vsub.f32 %v259_v10, %v282_v13  ;;  %376 = vmatpush.msra.mxu3 %v282_v13 }
  0x13   : > { %v500_v19 = vsub.f32 %v256_v12, %v465_v14  ;;  %v469_v32 = vand.u32 4294901760, %v468_v25  ;;  %v477_v37 = vand.u32 4294901760, %v476_v35 }
  0x14   : > { %v287_v15 = vsub.f32 %v285_v7, %v286_v11  ;;  %380 = vmatmul.f32.vlgmr.msra.gmra.mxu3 %v286_v11  ;;  %348 = vmatpush.msra.mxu2 %v317_v18  ;;  %v318_v22 = vand.u32 4294901760, %v317_v18  ;;  %v295_v24 = vsub.f32 %v293_v8, %v294_v16 }
  0x15   : > { %v501_v23 = vand.u32 4294901760, %v500_v19  ;;  %351 = vmatmul.f32.vlgmr.msra.gmra.mxu2 %v285_v7  ;;  %v470_v34 = vsub.f32 %v468_v25, %v469_v32  ;;  %v478_v38 = vsub.f32 %v476_v35, %v477_v37 }
  0x16   : > { %v288_v20 = vand.u32 4294901760, %v287_v15  ;;  %466 = vmatpush.msrb.mxu2 %v465_v14  ;;  %v319_v26 = vsub.f32 %v317_v18, %v318_v22  ;;  %408 = vmatpush.msrb.mxu0 %v318_v22  ;;  %v296_v31 = vand.u32 4294901760, %v295_v24 }
  0x17   : > { %v502_v27 = vsub.f32 %v500_v19, %v501_v23  ;;  %v471_v36 = vand.u32 4294901760, %v470_v34  ;;  %v479_v39 = vand.u32 4294901760, %v478_v38 }
  0x18   : > { %289 = vmatmul.f32.vlgmr.msra.gmra.mxu0 %v288_v20  ;;  %591 = vmatpush.msra.mxu2 %v501_v23  ;;  %v320_v29 = vand.u32 4294901760, %v319_v26 }
  0x19   : > { %531 = vmatpush.msra.mxu0 %v500_v19  ;;  %v503_v30 = vand.u32 4294901760, %v502_v27 }
  0x1a   : > { %321 = vmatpush.msra.mxu1 %v320_v29 }
  0x1b   : > { %504 = vmatpush.msrb.mxu3 %v503_v30  ;;  %323 = vmatmul.f32.vlgmr.msra.gmra.mxu1 %v284_v4 }
  0x1c   : > { %386 = vmatmul.f32.gmra.mxu3 %v294_v16  ;;  %434 = vmatpush.msrb.mxu1 %v282_v13 }
  0x1d   : > { %617 = vmatpush.msra.mxu3 %v465_v14  ;;  %356 = vmatmul.f32.gmra.mxu2 %v293_v8 }
  0x1e   : > { %559 = vmatpush.msra.mxu1 %v465_v14 }
  0x20   : > { %297 = vmatmul.f32.gmra.mxu0 %v296_v31 }
  0x23   : > { %327 = vmatmul.f32.gmra.mxu1 %v838_v5 }
  0x24   : > { %506 = vmatmul.f32.vlgmr.msrb.gmra.mxu3 %v467_v17 }
  0x25   : > { %472 = vmatmul.f32.vlgmr.msrb.gmra.mxu2 %v471_v36 }
  0x28   : > { %410 = vmatmul.f32.vlgmr.msrb.gmra.mxu0 %v284_v4 }
  0x2b   : > { %436 = vmatmul.f32.vlgmr.msrb.gmra.mxu1 %v284_v4 }
  0x2c   : > { %510 = vmatmul.f32.gmra.mxu3 %v475_v33 }
  0x2d   : > { %480 = vmatmul.f32.gmra.mxu2 %v479_v39 }
  0x30   : > { %414 = vmatmul.f32.gmra.mxu0 %v838_v5 }
  0x33   : > { %440 = vmatmul.f32.gmra.mxu1 %v838_v5 }
  0x34   : > { %619 = vmatmul.f32.vlgmr.msra.gmra.mxu3 %v467_v17 }
  0x35   : > { %593 = vmatmul.f32.vlgmr.msra.gmra.mxu2 %v467_v17 }
  0x38   : > { %534 = vmatmul.f32.vlgmr.msra.gmra.mxu0 %v468_v25 }
  0x3b   : > { %563 = vmatmul.f32.vlgmr.msra.gmra.mxu1 %v469_v32 }
  0x3c   : > { %623 = vmatmul.f32.gmra.mxu3 %v475_v33 }
  0x3d   : > { %597 = vmatmul.f32.gmra.mxu2 %v475_v33 }
  0x40   : > { %539 = vmatmul.f32.gmra.mxu0 %v476_v35 }
  0x43   : > { %569 = vmatmul.f32.gmra.mxu1 %v477_v37 }
  0x95   : > { %v290_v40 = vpop.f32.mrf.mxu0 }
  0x97   : > { %v381_v41 = vpop.f32.mrf.mxu3 }
  0x98   : > { %v324_v42 = vpop.f32.mrf.mxu1  ;;  %v352_v43 = vpop.f32.mrf.mxu2 }
  0x99   : > { %v325_v48 = vadd.f32 %v324_v42, %v290_v40 }
  0x9b   : > { %v353_v50 = vadd.f32 %v352_v43, %v325_v48 }
  0x9d   : > { %v298_v44 = vpop.f32.mrf.mxu0  ;;  %v382_v54 = vadd.f32 %v381_v41, %v353_v50 }
  0x9f   : > { %v387_v45 = vpop.f32.mrf.mxu3 }
  0xa0   : > { %v328_v46 = vpop.f32.mrf.mxu1  ;;  %v357_v47 = vpop.f32.mrf.mxu2 }
  0xa1   : > { %v329_v55 = vadd.f32 %v328_v46, %v298_v44 }
  0xa3   : > { %v358_v58 = vadd.f32 %v357_v47, %v329_v55 }
  0xa5   : > { %v411_v49 = vpop.f32.mrf.mxu0  ;;  %v388_v63 = vadd.f32 %v387_v45, %v358_v58 }
  0xa6   : > { %v412_v57 = vadd.f32 %v411_v49, %v382_v54 }
  0xa7   : > { %v507_v51 = vpop.f32.mrf.mxu3 }
  0xa8   : > { %v437_v52 = vpop.f32.mrf.mxu1  ;;  %v473_v53 = vpop.f32.mrf.mxu2 }
  0xa9   : > { %v438_v59 = vadd.f32 %v437_v52, %v412_v57 }
  0xab   : > { %v474_v0 = vadd.f32 %v473_v53, %v438_v59 }
  0xad   : > { %v415_v56 = vpop.f32.mrf.mxu0  ;;  %v508_v3 = vadd.f32 %v507_v51, %v474_v0 }
  0xae   : > { %v416_v2 = vadd.f32 %v415_v56, %v388_v63 }
  0xaf   : > { %v511_v60 = vpop.f32.mrf.mxu3 }
  0xb0   : > { %v441_v61 = vpop.f32.mrf.mxu1  ;;  %v481_v62 = vpop.f32.mrf.mxu2 }
  0xb1   : > { %v442_v4 = vadd.f32 %v441_v61, %v416_v2 }
  0xb3   : > { %v482_v9 = vadd.f32 %v481_v62, %v442_v4 }
  0xb5   : > { %v535_v1 = vpop.f32.mrf.mxu0  ;;  %v512_v13 = vadd.f32 %v511_v60, %v482_v9 }
  0xb6   : > { %v536_v5 = vadd.f32 %v535_v1, %v508_v3 }
  0xb7   : > { %v620_v6 = vpop.f32.mrf.mxu3 }
  0xb8   : > { %v564_v7 = vpop.f32.mrf.mxu1  ;;  %v594_v8 = vpop.f32.mrf.mxu2 }
  0xb9   : > { %v565_v10 = vadd.f32 %v564_v7, %v536_v5 }
  0xbb   : > { %v595_v11 = vadd.f32 %v594_v8, %v565_v10 }
  0xbd   : > { %v540_v12 = vpop.f32.mrf.mxu0  ;;  %v621_v14 = vadd.f32 %v620_v6, %v595_v11 }
  0xbe   : > { %v541_v15 = vadd.f32 %v540_v12, %v512_v13 }
  0xbf   : > { %628 = vst.msk [vmem:[%s253_s11] sm:$0xff] %vm627_vm1, %v621_v14  ;;  %v624_v19 = vpop.f32.mrf.mxu3 }
  0xc0   : > { %v570_v16 = vpop.f32.mrf.mxu1  ;;  %v598_v17 = vpop.f32.mrf.mxu2 }
  0xc1   : > { %v571_v18 = vadd.f32 %v570_v16, %v541_v15 }
  0xc3   : > { %v599_v20 = vadd.f32 %v598_v17, %v571_v18 }
  0xc5   : > { %v625_v21 = vadd.f32 %v624_v19, %v599_v20 }
  0xc7   : > { %629 = vst.msk [vmem:[%s253_s11 + $0x8] sm:$0xff] %vm627_vm1, %v625_v21 }
  0xc8 PF: > { %s14_s17 = sadd.s32 1, %s783_s17   ;;  %s877_s15 = smov %s779_s16 }
  0xc9   : > { %p11_p5 = scmp.ge.s32.totalorder %s14_s17, 8   ;;  %s878_s16 = smov %s880_s18 }
  0xcb   :  { %13 = sbr.rel (!%p11_p5) target bundleno = 2 (0x2), region = 69 }

// kernel: multiwavelet_cross_forward.10
= control target key start
LH: loop header
LB: loop body
LE: loop exit
PB: predicated region body
PF: predicated region fallthrough
CT: control target
= control target key end

     0   :  { %s809_s15 = smov 0   ;;  %s811_s16 = smov 0   ;;  %s873_s0 = inlined_call_operand.vmem [shape: f32[6,8,8], index: 0, kind: input, shape index: {}]   ;;  %s874_s1 = inlined_call_operand.vmem [shape: f32[6,8,8], index: 1, kind: input, shape index: {}]   ;;  %s875_s2 = inlined_call_operand.vmem [shape: f32[16,8], index: 2, kind: input, shape index: {}]   ;;  %s876_s3 = inlined_call_operand.vmem [shape: f32[16,8], index: 3, kind: input, shape index: {}]   ;;  %s877_s4 = inlined_call_operand.vmem [shape: f32[6,16,8], index: 4, kind: output, shape index: {}]  }
   0x1   :  { %s813_s17 = smov 0  }
   0x2 LB: > { %s26_s18 = sadd.s32 1, %s778_s16  ;;  %p728_p0 = scmp.ge.s32.totalorder %s782_s17, 1  ;;  %s782_s17 = sphi %s813_s17, %s14_s17   ;;  %s778_s16 = sphi %s811_s16, %s879_s16   ;;  %s774_s15 = sphi %s809_s15, %s878_s15  }
   0x3   : > { %p28_p1 = scmp.ge.s32.totalorder %s26_s18, 6  ;;  %p194_p2 = scmp.lt.s32.totalorder %s782_s17, 7 }
   0x5   : > { %s881_s18 = smov (%p28_p1, %s26_s18), 0  ;;  %p195_p3 = pnand %p728_p0, %p194_p2 }
   0x6   : > { %p232_p4 = scmp.lt.s32.totalorder (!%p195_p3), %s774_s15, 5 }
   0x7   : > { %198 = sbr.rel (%p195_p3) target bundleno = 200 (0xc8), region = 36 }
   0xc   : > { %v257_v0 = vld [vmem:[%s876_s3] sm:$0xff]  ;;  %vm260_vm0 = vcmask 64512   ;;  %v258_v1 = vld [vmem:[%s876_s3 + $0x8] sm:$0xff]  ;;  %s883_s15 = smov (!%p232_p4, %s774_s15), 5 }
   0xd   : > { %v262_v2 = vsel %vm260_vm0, %v257_v0, 0  ;;  %v265_v3 = vsel %vm260_vm0, %v258_v1, 0  ;;  %v254_v6 = vld [vmem:[%s875_s2] sm:$0xff]  ;;  %s729_s25 = sshll.u32 %s883_s15, 3  ;;  %v255_v21 = vld [vmem:[%s875_s2 + $0x8] sm:$0xff]  ;;  %s735_s8 = sshll.u32 %s883_s15, 4 }
   0xe   : > { %v284_v4 = vand.u32 4294901760, %v262_v2  ;;  %v837_v5 = vand.u32 4294901760, %v265_v3  ;;  %s245_s28 = scalar_lea.vmem %s874_s1, %s729_s25  ;;  %s238_s5 = scalar_lea.vmem %s873_s0, %s729_s25  ;;  %v445_v9 = vsel %vm260_vm0, %v254_v6, 0  ;;  %v448_v28 = vsel %vm260_vm0, %v255_v21, 0 }
   0xf   : > { %v259_v10 = vld [vmem:[%s245_s28] sm:$0xff]  ;;  %v467_v17 = vand.u32 4294901760, %v445_v9  ;;  %v475_v33 = vand.u32 4294901760, %v448_v28  ;;  %s253_s11 = scalar_lea.vmem %s877_s4, %s735_s8 }
  0x10   : > { %v285_v7 = vsub.f32 %v262_v2, %v284_v4  ;;  %v293_v8 = vsub.f32 %v265_v3, %v837_v5  ;;  %v256_v12 = vld [vmem:[%s238_s5] sm:$0xff]  ;;  %v282_v13 = vand.u32 4294901760, %v259_v10 }
  0x11   : > { %v465_v14 = vand.u32 4294901760, %v256_v12  ;;  %v468_v25 = vsub.f32 %v445_v9, %v467_v17  ;;  %v476_v35 = vsub.f32 %v448_v28, %v475_v33 }
  0x12   : > { %v286_v11 = vand.u32 4294901760, %v285_v7  ;;  %v294_v16 = vand.u32 4294901760, %v293_v8  ;;  %283 = vmatpush.msra.mxu0 %v282_v13  ;;  %v317_v18 = vsub.f32 %v259_v10, %v282_v13  ;;  %376 = vmatpush.msra.mxu3 %v282_v13 }
  0x13   : > { %v500_v19 = vsub.f32 %v256_v12, %v465_v14  ;;  %v469_v32 = vand.u32 4294901760, %v468_v25  ;;  %v477_v37 = vand.u32 4294901760, %v476_v35 }
  0x14   : > { %v287_v15 = vsub.f32 %v285_v7, %v286_v11  ;;  %380 = vmatmul.f32.vlgmr.msra.gmra.mxu3 %v286_v11  ;;  %348 = vmatpush.msra.mxu2 %v317_v18  ;;  %v318_v22 = vand.u32 4294901760, %v317_v18  ;;  %v295_v24 = vsub.f32 %v293_v8, %v294_v16 }
  0x15   : > { %v501_v23 = vand.u32 4294901760, %v500_v19  ;;  %351 = vmatmul.f32.vlgmr.msra.gmra.mxu2 %v285_v7  ;;  %v470_v34 = vsub.f32 %v468_v25, %v469_v32  ;;  %v478_v38 = vsub.f32 %v476_v35, %v477_v37 }
  0x16   : > { %v288_v20 = vand.u32 4294901760, %v287_v15  ;;  %466 = vmatpush.msrb.mxu2 %v465_v14  ;;  %v319_v26 = vsub.f32 %v317_v18, %v318_v22  ;;  %408 = vmatpush.msrb.mxu0 %v318_v22  ;;  %v296_v31 = vand.u32 4294901760, %v295_v24 }
  0x17   : > { %v502_v27 = vsub.f32 %v500_v19, %v501_v23  ;;  %v471_v36 = vand.u32 4294901760, %v470_v34  ;;  %v479_v39 = vand.u32 4294901760, %v478_v38 }
  0x18   : > { %289 = vmatmul.f32.vlgmr.msra.gmra.mxu0 %v288_v20  ;;  %591 = vmatpush.msra.mxu2 %v501_v23  ;;  %v320_v29 = vand.u32 4294901760, %v319_v26 }
  0x19   : > { %531 = vmatpush.msra.mxu0 %v500_v19  ;;  %v503_v30 = vand.u32 4294901760, %v502_v27 }
  0x1a   : > { %321 = vmatpush.msra.mxu1 %v320_v29 }
  0x1b   : > { %504 = vmatpush.msrb.mxu3 %v503_v30  ;;  %323 = vmatmul.f32.vlgmr.msra.gmra.mxu1 %v284_v4 }
  0x1c   : > { %386 = vmatmul.f32.gmra.mxu3 %v294_v16  ;;  %434 = vmatpush.msrb.mxu1 %v282_v13 }
  0x1d   : > { %617 = vmatpush.msra.mxu3 %v465_v14  ;;  %356 = vmatmul.f32.gmra.mxu2 %v293_v8 }
  0x1e   : > { %559 = vmatpush.msra.mxu1 %v465_v14 }
  0x20   : > { %297 = vmatmul.f32.gmra.mxu0 %v296_v31 }
  0x23   : > { %327 = vmatmul.f32.gmra.mxu1 %v837_v5 }
  0x24   : > { %506 = vmatmul.f32.vlgmr.msrb.gmra.mxu3 %v467_v17 }
  0x25   : > { %472 = vmatmul.f32.vlgmr.msrb.gmra.mxu2 %v471_v36 }
  0x28   : > { %410 = vmatmul.f32.vlgmr.msrb.gmra.mxu0 %v284_v4 }
  0x2b   : > { %436 = vmatmul.f32.vlgmr.msrb.gmra.mxu1 %v284_v4 }
  0x2c   : > { %510 = vmatmul.f32.gmra.mxu3 %v475_v33 }
  0x2d   : > { %480 = vmatmul.f32.gmra.mxu2 %v479_v39 }
  0x30   : > { %414 = vmatmul.f32.gmra.mxu0 %v837_v5 }
  0x33   : > { %440 = vmatmul.f32.gmra.mxu1 %v837_v5 }
  0x34   : > { %619 = vmatmul.f32.vlgmr.msra.gmra.mxu3 %v467_v17 }
  0x35   : > { %593 = vmatmul.f32.vlgmr.msra.gmra.mxu2 %v467_v17 }
  0x38   : > { %534 = vmatmul.f32.vlgmr.msra.gmra.mxu0 %v468_v25 }
  0x3b   : > { %563 = vmatmul.f32.vlgmr.msra.gmra.mxu1 %v469_v32 }
  0x3c   : > { %623 = vmatmul.f32.gmra.mxu3 %v475_v33 }
  0x3d   : > { %597 = vmatmul.f32.gmra.mxu2 %v475_v33 }
  0x40   : > { %539 = vmatmul.f32.gmra.mxu0 %v476_v35 }
  0x43   : > { %569 = vmatmul.f32.gmra.mxu1 %v477_v37 }
  0x95   : > { %v290_v40 = vpop.f32.mrf.mxu0 }
  0x97   : > { %v381_v41 = vpop.f32.mrf.mxu3 }
  0x98   : > { %v324_v42 = vpop.f32.mrf.mxu1  ;;  %v352_v43 = vpop.f32.mrf.mxu2 }
  0x99   : > { %v325_v48 = vadd.f32 %v324_v42, %v290_v40 }
  0x9b   : > { %v353_v50 = vadd.f32 %v352_v43, %v325_v48 }
  0x9d   : > { %v298_v44 = vpop.f32.mrf.mxu0  ;;  %v382_v54 = vadd.f32 %v381_v41, %v353_v50 }
  0x9f   : > { %v387_v45 = vpop.f32.mrf.mxu3 }
  0xa0   : > { %v328_v46 = vpop.f32.mrf.mxu1  ;;  %v357_v47 = vpop.f32.mrf.mxu2 }
  0xa1   : > { %v329_v55 = vadd.f32 %v328_v46, %v298_v44 }
  0xa3   : > { %v358_v58 = vadd.f32 %v357_v47, %v329_v55 }
  0xa5   : > { %v411_v49 = vpop.f32.mrf.mxu0  ;;  %v388_v63 = vadd.f32 %v387_v45, %v358_v58 }
  0xa6   : > { %v412_v57 = vadd.f32 %v411_v49, %v382_v54 }
  0xa7   : > { %v507_v51 = vpop.f32.mrf.mxu3 }
  0xa8   : > { %v437_v52 = vpop.f32.mrf.mxu1  ;;  %v473_v53 = vpop.f32.mrf.mxu2 }
  0xa9   : > { %v438_v59 = vadd.f32 %v437_v52, %v412_v57 }
  0xab   : > { %v474_v0 = vadd.f32 %v473_v53, %v438_v59 }
  0xad   : > { %v415_v56 = vpop.f32.mrf.mxu0  ;;  %v508_v3 = vadd.f32 %v507_v51, %v474_v0 }
  0xae   : > { %v416_v2 = vadd.f32 %v415_v56, %v388_v63 }
  0xaf   : > { %v511_v60 = vpop.f32.mrf.mxu3 }
  0xb0   : > { %v441_v61 = vpop.f32.mrf.mxu1  ;;  %v481_v62 = vpop.f32.mrf.mxu2 }
  0xb1   : > { %v442_v4 = vadd.f32 %v441_v61, %v416_v2 }
  0xb3   : > { %v482_v9 = vadd.f32 %v481_v62, %v442_v4 }
  0xb5   : > { %v535_v1 = vpop.f32.mrf.mxu0  ;;  %v512_v13 = vadd.f32 %v511_v60, %v482_v9 }
  0xb6   : > { %v536_v5 = vadd.f32 %v535_v1, %v508_v3 }
  0xb7   : > { %v620_v6 = vpop.f32.mrf.mxu3 }
  0xb8   : > { %v564_v7 = vpop.f32.mrf.mxu1  ;;  %v594_v8 = vpop.f32.mrf.mxu2 }
  0xb9   : > { %v565_v10 = vadd.f32 %v564_v7, %v536_v5 }
  0xbb   : > { %v595_v11 = vadd.f32 %v594_v8, %v565_v10 }
  0xbd   : > { %v540_v12 = vpop.f32.mrf.mxu0  ;;  %v621_v14 = vadd.f32 %v620_v6, %v595_v11 }
  0xbe   : > { %v541_v15 = vadd.f32 %v540_v12, %v512_v13 }
  0xbf   : > { %627 = vst.msk [vmem:[%s253_s11] sm:$0xff] %vm260_vm0, %v621_v14  ;;  %v624_v19 = vpop.f32.mrf.mxu3 }
  0xc0   : > { %v570_v16 = vpop.f32.mrf.mxu1  ;;  %v598_v17 = vpop.f32.mrf.mxu2 }
  0xc1   : > { %v571_v18 = vadd.f32 %v570_v16, %v541_v15 }
  0xc3   : > { %v599_v20 = vadd.f32 %v598_v17, %v571_v18 }
  0xc5   : > { %v625_v21 = vadd.f32 %v624_v19, %v599_v20 }
  0xc7   : > { %628 = vst.msk [vmem:[%s253_s11 + $0x8] sm:$0xff] %vm260_vm0, %v625_v21 }
  0xc8 PF: > { %s14_s17 = sadd.s32 1, %s782_s17   ;;  %s878_s15 = smov %s778_s16 }
  0xc9   : > { %p11_p5 = scmp.ge.s32.totalorder %s14_s17, 8   ;;  %s879_s16 = smov %s881_s18 }
  0xcb   :  { %13 = sbr.rel (!%p11_p5) target bundleno = 2 (0x2), region = 69 }

// kernel: multiwavelet_cross_forward.11
= control target key start
LH: loop header
LB: loop body
LE: loop exit
PB: predicated region body
PF: predicated region fallthrough
CT: control target
= control target key end

     0   :  { %s809_s15 = smov 0   ;;  %s811_s16 = smov 0   ;;  %s873_s0 = inlined_call_operand.vmem [shape: f32[2,8,8], index: 0, kind: input, shape index: {}]   ;;  %s874_s1 = inlined_call_operand.vmem [shape: f32[2,8,8], index: 1, kind: input, shape index: {}]   ;;  %s875_s2 = inlined_call_operand.vmem [shape: f32[16,8], index: 2, kind: input, shape index: {}]   ;;  %s876_s3 = inlined_call_operand.vmem [shape: f32[16,8], index: 3, kind: input, shape index: {}]   ;;  %s877_s4 = inlined_call_operand.vmem [shape: f32[2,16,8], index: 4, kind: output, shape index: {}]  }
   0x1   :  { %s813_s17 = smov 0  }
   0x2 LB: > { %s26_s18 = sadd.s32 1, %s778_s16  ;;  %p728_p0 = scmp.ge.s32.totalorder %s782_s17, 1  ;;  %s782_s17 = sphi %s813_s17, %s14_s17   ;;  %s778_s16 = sphi %s811_s16, %s879_s16   ;;  %s774_s15 = sphi %s809_s15, %s878_s15  }
   0x3   : > { %p28_p1 = scmp.ge.s32.totalorder %s26_s18, 2  ;;  %p194_p2 = scmp.lt.s32.totalorder %s782_s17, 3 }
   0x5   : > { %s881_s18 = smov (%p28_p1, %s26_s18), 0  ;;  %p195_p3 = pnand %p728_p0, %p194_p2 }
   0x6   : > { %p232_p4 = scmp.lt.s32.totalorder (!%p195_p3), %s774_s15, 1 }
   0x7   : > { %198 = sbr.rel (%p195_p3) target bundleno = 200 (0xc8), region = 36 }
   0xc   : > { %v257_v0 = vld [vmem:[%s876_s3] sm:$0xff]  ;;  %vm260_vm0 = vcmask 64512   ;;  %v258_v1 = vld [vmem:[%s876_s3 + $0x8] sm:$0xff]  ;;  %s883_s15 = smov (!%p232_p4, %s774_s15), 1 }
   0xd   : > { %v262_v2 = vsel %vm260_vm0, %v257_v0, 0  ;;  %v265_v3 = vsel %vm260_vm0, %v258_v1, 0  ;;  %v254_v6 = vld [vmem:[%s875_s2] sm:$0xff]  ;;  %s729_s25 = sshll.u32 %s883_s15, 3  ;;  %v255_v21 = vld [vmem:[%s875_s2 + $0x8] sm:$0xff]  ;;  %s735_s8 = sshll.u32 %s883_s15, 4 }
   0xe   : > { %v284_v4 = vand.u32 4294901760, %v262_v2  ;;  %v837_v5 = vand.u32 4294901760, %v265_v3  ;;  %s245_s28 = scalar_lea.vmem %s874_s1, %s729_s25  ;;  %s238_s5 = scalar_lea.vmem %s873_s0, %s729_s25  ;;  %v445_v9 = vsel %vm260_vm0, %v254_v6, 0  ;;  %v448_v28 = vsel %vm260_vm0, %v255_v21, 0 }
   0xf   : > { %v259_v10 = vld [vmem:[%s245_s28] sm:$0xff]  ;;  %v467_v17 = vand.u32 4294901760, %v445_v9  ;;  %v475_v33 = vand.u32 4294901760, %v448_v28  ;;  %s253_s11 = scalar_lea.vmem %s877_s4, %s735_s8 }
  0x10   : > { %v285_v7 = vsub.f32 %v262_v2, %v284_v4  ;;  %v293_v8 = vsub.f32 %v265_v3, %v837_v5  ;;  %v256_v12 = vld [vmem:[%s238_s5] sm:$0xff]  ;;  %v282_v13 = vand.u32 4294901760, %v259_v10 }
  0x11   : > { %v465_v14 = vand.u32 4294901760, %v256_v12  ;;  %v468_v25 = vsub.f32 %v445_v9, %v467_v17  ;;  %v476_v35 = vsub.f32 %v448_v28, %v475_v33 }
  0x12   : > { %v286_v11 = vand.u32 4294901760, %v285_v7  ;;  %v294_v16 = vand.u32 4294901760, %v293_v8  ;;  %283 = vmatpush.msra.mxu0 %v282_v13  ;;  %v317_v18 = vsub.f32 %v259_v10, %v282_v13  ;;  %376 = vmatpush.msra.mxu3 %v282_v13 }
  0x13   : > { %v500_v19 = vsub.f32 %v256_v12, %v465_v14  ;;  %v469_v32 = vand.u32 4294901760, %v468_v25  ;;  %v477_v37 = vand.u32 4294901760, %v476_v35 }
  0x14   : > { %v287_v15 = vsub.f32 %v285_v7, %v286_v11  ;;  %380 = vmatmul.f32.vlgmr.msra.gmra.mxu3 %v286_v11  ;;  %348 = vmatpush.msra.mxu2 %v317_v18  ;;  %v318_v22 = vand.u32 4294901760, %v317_v18  ;;  %v295_v24 = vsub.f32 %v293_v8, %v294_v16 }
  0x15   : > { %v501_v23 = vand.u32 4294901760, %v500_v19  ;;  %351 = vmatmul.f32.vlgmr.msra.gmra.mxu2 %v285_v7  ;;  %v470_v34 = vsub.f32 %v468_v25, %v469_v32  ;;  %v478_v38 = vsub.f32 %v476_v35, %v477_v37 }
  0x16   : > { %v288_v20 = vand.u32 4294901760, %v287_v15  ;;  %466 = vmatpush.msrb.mxu2 %v465_v14  ;;  %v319_v26 = vsub.f32 %v317_v18, %v318_v22  ;;  %408 = vmatpush.msrb.mxu0 %v318_v22  ;;  %v296_v31 = vand.u32 4294901760, %v295_v24 }
  0x17   : > { %v502_v27 = vsub.f32 %v500_v19, %v501_v23  ;;  %v471_v36 = vand.u32 4294901760, %v470_v34  ;;  %v479_v39 = vand.u32 4294901760, %v478_v38 }
  0x18   : > { %289 = vmatmul.f32.vlgmr.msra.gmra.mxu0 %v288_v20  ;;  %591 = vmatpush.msra.mxu2 %v501_v23  ;;  %v320_v29 = vand.u32 4294901760, %v319_v26 }
  0x19   : > { %531 = vmatpush.msra.mxu0 %v500_v19  ;;  %v503_v30 = vand.u32 4294901760, %v502_v27 }
  0x1a   : > { %321 = vmatpush.msra.mxu1 %v320_v29 }
  0x1b   : > { %504 = vmatpush.msrb.mxu3 %v503_v30  ;;  %323 = vmatmul.f32.vlgmr.msra.gmra.mxu1 %v284_v4 }
  0x1c   : > { %386 = vmatmul.f32.gmra.mxu3 %v294_v16  ;;  %434 = vmatpush.msrb.mxu1 %v282_v13 }
  0x1d   : > { %617 = vmatpush.msra.mxu3 %v465_v14  ;;  %356 = vmatmul.f32.gmra.mxu2 %v293_v8 }
  0x1e   : > { %559 = vmatpush.msra.mxu1 %v465_v14 }
  0x20   : > { %297 = vmatmul.f32.gmra.mxu0 %v296_v31 }
  0x23   : > { %327 = vmatmul.f32.gmra.mxu1 %v837_v5 }
  0x24   : > { %506 = vmatmul.f32.vlgmr.msrb.gmra.mxu3 %v467_v17 }
  0x25   : > { %472 = vmatmul.f32.vlgmr.msrb.gmra.mxu2 %v471_v36 }
  0x28   : > { %410 = vmatmul.f32.vlgmr.msrb.gmra.mxu0 %v284_v4 }
  0x2b   : > { %436 = vmatmul.f32.vlgmr.msrb.gmra.mxu1 %v284_v4 }
  0x2c   : > { %510 = vmatmul.f32.gmra.mxu3 %v475_v33 }
  0x2d   : > { %480 = vmatmul.f32.gmra.mxu2 %v479_v39 }
  0x30   : > { %414 = vmatmul.f32.gmra.mxu0 %v837_v5 }
  0x33   : > { %440 = vmatmul.f32.gmra.mxu1 %v837_v5 }
  0x34   : > { %619 = vmatmul.f32.vlgmr.msra.gmra.mxu3 %v467_v17 }
  0x35   : > { %593 = vmatmul.f32.vlgmr.msra.gmra.mxu2 %v467_v17 }
  0x38   : > { %534 = vmatmul.f32.vlgmr.msra.gmra.mxu0 %v468_v25 }
  0x3b   : > { %563 = vmatmul.f32.vlgmr.msra.gmra.mxu1 %v469_v32 }
  0x3c   : > { %623 = vmatmul.f32.gmra.mxu3 %v475_v33 }
  0x3d   : > { %597 = vmatmul.f32.gmra.mxu2 %v475_v33 }
  0x40   : > { %539 = vmatmul.f32.gmra.mxu0 %v476_v35 }
  0x43   : > { %569 = vmatmul.f32.gmra.mxu1 %v477_v37 }
  0x95   : > { %v290_v40 = vpop.f32.mrf.mxu0 }
  0x97   : > { %v381_v41 = vpop.f32.mrf.mxu3 }
  0x98   : > { %v324_v42 = vpop.f32.mrf.mxu1  ;;  %v352_v43 = vpop.f32.mrf.mxu2 }
  0x99   : > { %v325_v48 = vadd.f32 %v324_v42, %v290_v40 }
  0x9b   : > { %v353_v50 = vadd.f32 %v352_v43, %v325_v48 }
  0x9d   : > { %v298_v44 = vpop.f32.mrf.mxu0  ;;  %v382_v54 = vadd.f32 %v381_v41, %v353_v50 }
  0x9f   : > { %v387_v45 = vpop.f32.mrf.mxu3 }
  0xa0   : > { %v328_v46 = vpop.f32.mrf.mxu1  ;;  %v357_v47 = vpop.f32.mrf.mxu2 }
  0xa1   : > { %v329_v55 = vadd.f32 %v328_v46, %v298_v44 }
  0xa3   : > { %v358_v58 = vadd.f32 %v357_v47, %v329_v55 }
  0xa5   : > { %v411_v49 = vpop.f32.mrf.mxu0  ;;  %v388_v63 = vadd.f32 %v387_v45, %v358_v58 }
  0xa6   : > { %v412_v57 = vadd.f32 %v411_v49, %v382_v54 }
  0xa7   : > { %v507_v51 = vpop.f32.mrf.mxu3 }
  0xa8   : > { %v437_v52 = vpop.f32.mrf.mxu1  ;;  %v473_v53 = vpop.f32.mrf.mxu2 }
  0xa9   : > { %v438_v59 = vadd.f32 %v437_v52, %v412_v57 }
  0xab   : > { %v474_v0 = vadd.f32 %v473_v53, %v438_v59 }
  0xad   : > { %v415_v56 = vpop.f32.mrf.mxu0  ;;  %v508_v3 = vadd.f32 %v507_v51, %v474_v0 }
  0xae   : > { %v416_v2 = vadd.f32 %v415_v56, %v388_v63 }
  0xaf   : > { %v511_v60 = vpop.f32.mrf.mxu3 }
  0xb0   : > { %v441_v61 = vpop.f32.mrf.mxu1  ;;  %v481_v62 = vpop.f32.mrf.mxu2 }
  0xb1   : > { %v442_v4 = vadd.f32 %v441_v61, %v416_v2 }
  0xb3   : > { %v482_v9 = vadd.f32 %v481_v62, %v442_v4 }
  0xb5   : > { %v535_v1 = vpop.f32.mrf.mxu0  ;;  %v512_v13 = vadd.f32 %v511_v60, %v482_v9 }
  0xb6   : > { %v536_v5 = vadd.f32 %v535_v1, %v508_v3 }
  0xb7   : > { %v620_v6 = vpop.f32.mrf.mxu3 }
  0xb8   : > { %v564_v7 = vpop.f32.mrf.mxu1  ;;  %v594_v8 = vpop.f32.mrf.mxu2 }
  0xb9   : > { %v565_v10 = vadd.f32 %v564_v7, %v536_v5 }
  0xbb   : > { %v595_v11 = vadd.f32 %v594_v8, %v565_v10 }
  0xbd   : > { %v540_v12 = vpop.f32.mrf.mxu0  ;;  %v621_v14 = vadd.f32 %v620_v6, %v595_v11 }
  0xbe   : > { %v541_v15 = vadd.f32 %v540_v12, %v512_v13 }
  0xbf   : > { %627 = vst.msk [vmem:[%s253_s11] sm:$0xff] %vm260_vm0, %v621_v14  ;;  %v624_v19 = vpop.f32.mrf.mxu3 }
  0xc0   : > { %v570_v16 = vpop.f32.mrf.mxu1  ;;  %v598_v17 = vpop.f32.mrf.mxu2 }
  0xc1   : > { %v571_v18 = vadd.f32 %v570_v16, %v541_v15 }
  0xc3   : > { %v599_v20 = vadd.f32 %v598_v17, %v571_v18 }
  0xc5   : > { %v625_v21 = vadd.f32 %v624_v19, %v599_v20 }
  0xc7   : > { %628 = vst.msk [vmem:[%s253_s11 + $0x8] sm:$0xff] %vm260_vm0, %v625_v21 }
  0xc8 PF: > { %s14_s17 = sadd.s32 1, %s782_s17   ;;  %s878_s15 = smov %s778_s16 }
  0xc9   : > { %p11_p5 = scmp.ge.s32.totalorder %s14_s17, 4   ;;  %s879_s16 = smov %s881_s18 }
  0xcb   :  { %13 = sbr.rel (!%p11_p5) target bundleno = 2 (0x2), region = 69 }

// kernel: multiwavelet_cross_forward.12
= control target key start
LH: loop header
LB: loop body
LE: loop exit
PB: predicated region body
PF: predicated region fallthrough
CT: control target
= control target key end

     0   :  { %s810_s15 = smov 0   ;;  %s812_s16 = smov 0   ;;  %s872_s0 = inlined_call_operand.vmem [shape: f32[2,8,16], index: 0, kind: input, shape index: {}]   ;;  %s873_s1 = inlined_call_operand.vmem [shape: f32[2,8,16], index: 1, kind: input, shape index: {}]   ;;  %s874_s2 = inlined_call_operand.vmem [shape: f32[16,8], index: 2, kind: input, shape index: {}]   ;;  %s875_s3 = inlined_call_operand.vmem [shape: f32[16,8], index: 3, kind: input, shape index: {}]   ;;  %s876_s4 = inlined_call_operand.vmem [shape: f32[2,16,16], index: 4, kind: output, shape index: {}]  }
   0x1   :  { %s814_s17 = smov 0  }
   0x2 LB: > { %s26_s18 = sadd.s32 1, %s779_s16  ;;  %p729_p0 = scmp.ge.s32.totalorder %s783_s17, 1  ;;  %s783_s17 = sphi %s814_s17, %s14_s17   ;;  %s779_s16 = sphi %s812_s16, %s878_s16   ;;  %s775_s15 = sphi %s810_s15, %s877_s15  }
   0x3   : > { %p28_p1 = scmp.ge.s32.totalorder %s26_s18, 2  ;;  %p194_p2 = scmp.lt.s32.totalorder %s783_s17, 3 }
   0x5   : > { %s880_s18 = smov (%p28_p1, %s26_s18), 0  ;;  %p195_p3 = pnand %p729_p0, %p194_p2 }
   0x6   : > { %p232_p4 = scmp.lt.s32.totalorder (!%p195_p3), %s775_s15, 1 }
   0x7   : > { %198 = sbr.rel (%p195_p3) target bundleno = 200 (0xc8), region = 36 }
   0xc   : > { %v257_v0 = vld [vmem:[%s875_s3] sm:$0xff]  ;;  %vm260_vm0 = vcmask 64512   ;;  %v258_v1 = vld [vmem:[%s875_s3 + $0x8] sm:$0xff]  ;;  %s882_s15 = smov (!%p232_p4, %s775_s15), 1  ;;  %vm627_vm1 = vcmask 130048  }
   0xd   : > { %v262_v2 = vsel %vm260_vm0, %v257_v0, 0  ;;  %v265_v3 = vsel %vm260_vm0, %v258_v1, 0  ;;  %v254_v6 = vld [vmem:[%s874_s2] sm:$0xff]  ;;  %s730_s25 = sshll.u32 %s882_s15, 3  ;;  %v255_v21 = vld [vmem:[%s874_s2 + $0x8] sm:$0xff]  ;;  %s736_s8 = sshll.u32 %s882_s15, 4 }
   0xe   : > { %v284_v4 = vand.u32 4294901760, %v262_v2  ;;  %v838_v5 = vand.u32 4294901760, %v265_v3  ;;  %s245_s28 = scalar_lea.vmem %s873_s1, %s730_s25  ;;  %s238_s5 = scalar_lea.vmem %s872_s0, %s730_s25  ;;  %v445_v9 = vsel %vm260_vm0, %v254_v6, 0  ;;  %v448_v28 = vsel %vm260_vm0, %v255_v21, 0 }
   0xf   : > { %v259_v10 = vld [vmem:[%s245_s28] sm:$0xff]  ;;  %v467_v17 = vand.u32 4294901760, %v445_v9  ;;  %v475_v33 = vand.u32 4294901760, %v448_v28  ;;  %s253_s11 = scalar_lea.vmem %s876_s4, %s736_s8 }
  0x10   : > { %v285_v7 = vsub.f32 %v262_v2, %v284_v4  ;;  %v293_v8 = vsub.f32 %v265_v3, %v838_v5  ;;  %v256_v12 = vld [vmem:[%s238_s5] sm:$0xff]  ;;  %v282_v13 = vand.u32 4294901760, %v259_v10 }
  0x11   : > { %v465_v14 = vand.u32 4294901760, %v256_v12  ;;  %v468_v25 = vsub.f32 %v445_v9, %v467_v17  ;;  %v476_v35 = vsub.f32 %v448_v28, %v475_v33 }
  0x12   : > { %v286_v11 = vand.u32 4294901760, %v285_v7  ;;  %v294_v16 = vand.u32 4294901760, %v293_v8  ;;  %283 = vmatpush.msra.mxu0 %v282_v13  ;;  %v317_v18 = vsub.f32 %v259_v10, %v282_v13  ;;  %376 = vmatpush.msra.mxu3 %v282_v13 }
  0x13   : > { %v500_v19 = vsub.f32 %v256_v12, %v465_v14  ;;  %v469_v32 = vand.u32 4294901760, %v468_v25  ;;  %v477_v37 = vand.u32 4294901760, %v476_v35 }
  0x14   : > { %v287_v15 = vsub.f32 %v285_v7, %v286_v11  ;;  %380 = vmatmul.f32.vlgmr.msra.gmra.mxu3 %v286_v11  ;;  %348 = vmatpush.msra.mxu2 %v317_v18  ;;  %v318_v22 = vand.u32 4294901760, %v317_v18  ;;  %v295_v24 = vsub.f32 %v293_v8, %v294_v16 }
  0x15   : > { %v501_v23 = vand.u32 4294901760, %v500_v19  ;;  %351 = vmatmul.f32.vlgmr.msra.gmra.mxu2 %v285_v7  ;;  %v470_v34 = vsub.f32 %v468_v25, %v469_v32  ;;  %v478_v38 = vsub.f32 %v476_v35, %v477_v37 }
  0x16   : > { %v288_v20 = vand.u32 4294901760, %v287_v15  ;;  %466 = vmatpush.msrb.mxu2 %v465_v14  ;;  %v319_v26 = vsub.f32 %v317_v18, %v318_v22  ;;  %408 = vmatpush.msrb.mxu0 %v318_v22  ;;  %v296_v31 = vand.u32 4294901760, %v295_v24 }
  0x17   : > { %v502_v27 = vsub.f32 %v500_v19, %v501_v23  ;;  %v471_v36 = vand.u32 4294901760, %v470_v34  ;;  %v479_v39 = vand.u32 4294901760, %v478_v38 }
  0x18   : > { %289 = vmatmul.f32.vlgmr.msra.gmra.mxu0 %v288_v20  ;;  %591 = vmatpush.msra.mxu2 %v501_v23  ;;  %v320_v29 = vand.u32 4294901760, %v319_v26 }
  0x19   : > { %531 = vmatpush.msra.mxu0 %v500_v19  ;;  %v503_v30 = vand.u32 4294901760, %v502_v27 }
  0x1a   : > { %321 = vmatpush.msra.mxu1 %v320_v29 }
  0x1b   : > { %504 = vmatpush.msrb.mxu3 %v503_v30  ;;  %323 = vmatmul.f32.vlgmr.msra.gmra.mxu1 %v284_v4 }
  0x1c   : > { %386 = vmatmul.f32.gmra.mxu3 %v294_v16  ;;  %434 = vmatpush.msrb.mxu1 %v282_v13 }
  0x1d   : > { %617 = vmatpush.msra.mxu3 %v465_v14  ;;  %356 = vmatmul.f32.gmra.mxu2 %v293_v8 }
  0x1e   : > { %559 = vmatpush.msra.mxu1 %v465_v14 }
  0x20   : > { %297 = vmatmul.f32.gmra.mxu0 %v296_v31 }
  0x23   : > { %327 = vmatmul.f32.gmra.mxu1 %v838_v5 }
  0x24   : > { %506 = vmatmul.f32.vlgmr.msrb.gmra.mxu3 %v467_v17 }
  0x25   : > { %472 = vmatmul.f32.vlgmr.msrb.gmra.mxu2 %v471_v36 }
  0x28   : > { %410 = vmatmul.f32.vlgmr.msrb.gmra.mxu0 %v284_v4 }
  0x2b   : > { %436 = vmatmul.f32.vlgmr.msrb.gmra.mxu1 %v284_v4 }
  0x2c   : > { %510 = vmatmul.f32.gmra.mxu3 %v475_v33 }
  0x2d   : > { %480 = vmatmul.f32.gmra.mxu2 %v479_v39 }
  0x30   : > { %414 = vmatmul.f32.gmra.mxu0 %v838_v5 }
  0x33   : > { %440 = vmatmul.f32.gmra.mxu1 %v838_v5 }
  0x34   : > { %619 = vmatmul.f32.vlgmr.msra.gmra.mxu3 %v467_v17 }
  0x35   : > { %593 = vmatmul.f32.vlgmr.msra.gmra.mxu2 %v467_v17 }
  0x38   : > { %534 = vmatmul.f32.vlgmr.msra.gmra.mxu0 %v468_v25 }
  0x3b   : > { %563 = vmatmul.f32.vlgmr.msra.gmra.mxu1 %v469_v32 }
  0x3c   : > { %623 = vmatmul.f32.gmra.mxu3 %v475_v33 }
  0x3d   : > { %597 = vmatmul.f32.gmra.mxu2 %v475_v33 }
  0x40   : > { %539 = vmatmul.f32.gmra.mxu0 %v476_v35 }
  0x43   : > { %569 = vmatmul.f32.gmra.mxu1 %v477_v37 }
  0x95   : > { %v290_v40 = vpop.f32.mrf.mxu0 }
  0x97   : > { %v381_v41 = vpop.f32.mrf.mxu3 }
  0x98   : > { %v324_v42 = vpop.f32.mrf.mxu1  ;;  %v352_v43 = vpop.f32.mrf.mxu2 }
  0x99   : > { %v325_v48 = vadd.f32 %v324_v42, %v290_v40 }
  0x9b   : > { %v353_v50 = vadd.f32 %v352_v43, %v325_v48 }
  0x9d   : > { %v298_v44 = vpop.f32.mrf.mxu0  ;;  %v382_v54 = vadd.f32 %v381_v41, %v353_v50 }
  0x9f   : > { %v387_v45 = vpop.f32.mrf.mxu3 }
  0xa0   : > { %v328_v46 = vpop.f32.mrf.mxu1  ;;  %v357_v47 = vpop.f32.mrf.mxu2 }
  0xa1   : > { %v329_v55 = vadd.f32 %v328_v46, %v298_v44 }
  0xa3   : > { %v358_v58 = vadd.f32 %v357_v47, %v329_v55 }
  0xa5   : > { %v411_v49 = vpop.f32.mrf.mxu0  ;;  %v388_v63 = vadd.f32 %v387_v45, %v358_v58 }
  0xa6   : > { %v412_v57 = vadd.f32 %v411_v49, %v382_v54 }
  0xa7   : > { %v507_v51 = vpop.f32.mrf.mxu3 }
  0xa8   : > { %v437_v52 = vpop.f32.mrf.mxu1  ;;  %v473_v53 = vpop.f32.mrf.mxu2 }
  0xa9   : > { %v438_v59 = vadd.f32 %v437_v52, %v412_v57 }
  0xab   : > { %v474_v0 = vadd.f32 %v473_v53, %v438_v59 }
  0xad   : > { %v415_v56 = vpop.f32.mrf.mxu0  ;;  %v508_v3 = vadd.f32 %v507_v51, %v474_v0 }
  0xae   : > { %v416_v2 = vadd.f32 %v415_v56, %v388_v63 }
  0xaf   : > { %v511_v60 = vpop.f32.mrf.mxu3 }
  0xb0   : > { %v441_v61 = vpop.f32.mrf.mxu1  ;;  %v481_v62 = vpop.f32.mrf.mxu2 }
  0xb1   : > { %v442_v4 = vadd.f32 %v441_v61, %v416_v2 }
  0xb3   : > { %v482_v9 = vadd.f32 %v481_v62, %v442_v4 }
  0xb5   : > { %v535_v1 = vpop.f32.mrf.mxu0  ;;  %v512_v13 = vadd.f32 %v511_v60, %v482_v9 }
  0xb6   : > { %v536_v5 = vadd.f32 %v535_v1, %v508_v3 }
  0xb7   : > { %v620_v6 = vpop.f32.mrf.mxu3 }
  0xb8   : > { %v564_v7 = vpop.f32.mrf.mxu1  ;;  %v594_v8 = vpop.f32.mrf.mxu2 }
  0xb9   : > { %v565_v10 = vadd.f32 %v564_v7, %v536_v5 }
  0xbb   : > { %v595_v11 = vadd.f32 %v594_v8, %v565_v10 }
  0xbd   : > { %v540_v12 = vpop.f32.mrf.mxu0  ;;  %v621_v14 = vadd.f32 %v620_v6, %v595_v11 }
  0xbe   : > { %v541_v15 = vadd.f32 %v540_v12, %v512_v13 }
  0xbf   : > { %628 = vst.msk [vmem:[%s253_s11] sm:$0xff] %vm627_vm1, %v621_v14  ;;  %v624_v19 = vpop.f32.mrf.mxu3 }
  0xc0   : > { %v570_v16 = vpop.f32.mrf.mxu1  ;;  %v598_v17 = vpop.f32.mrf.mxu2 }
  0xc1   : > { %v571_v18 = vadd.f32 %v570_v16, %v541_v15 }
  0xc3   : > { %v599_v20 = vadd.f32 %v598_v17, %v571_v18 }
  0xc5   : > { %v625_v21 = vadd.f32 %v624_v19, %v599_v20 }
  0xc7   : > { %629 = vst.msk [vmem:[%s253_s11 + $0x8] sm:$0xff] %vm627_vm1, %v625_v21 }
  0xc8 PF: > { %s14_s17 = sadd.s32 1, %s783_s17   ;;  %s877_s15 = smov %s779_s16 }
  0xc9   : > { %p11_p5 = scmp.ge.s32.totalorder %s14_s17, 4   ;;  %s878_s16 = smov %s880_s18 }
  0xcb   :  { %13 = sbr.rel (!%p11_p5) target bundleno = 2 (0x2), region = 69 }

// kernel: multiwavelet_cross_forward.13
= control target key start
LH: loop header
LB: loop body
LE: loop exit
PB: predicated region body
PF: predicated region fallthrough
CT: control target
= control target key end

     0   :  { %vm25_vm0 = vcmask 261120   ;;  %s391_s0 = inlined_call_operand.vmem [shape: f32[1,16,32], index: 0, kind: input, shape index: {}]   ;;  %s392_s1 = inlined_call_operand.vmem [shape: f32[1,32,32], index: 1, kind: input, shape index: {}]   ;;  %s393_s2 = inlined_call_operand.vmem [shape: f32[1,1,32], index: 2, kind: input, shape index: {}]   ;;  %s394_s3 = inlined_call_operand.hbm [shape: f32[1,16,32], index: 3, kind: output, shape index: {}]  }
   0x1   :  { %v20_v0 = vld [vmem:[%s392_s1 + $0x18] sm:$0xff]  ;;  %v19_v1 = vld [vmem:[%s392_s1 + $0x10] sm:$0xff]  ;;  %v18_v2 = vld [vmem:[%s392_s1 + $0x8] sm:$0xff] }
   0x2   :  { %v338_v3 = vand.u32 4294901760, %v20_v0  ;;  %v340_v4 = vand.u32 4294901760, %v19_v1  ;;  %v342_v5 = vand.u32 4294901760, %v18_v2  ;;  %v17_v6 = vld [vmem:[%s392_s1] sm:$0xff]  ;;  %v16_v7 = vld [vmem:[%s391_s0 + $0x8] sm:$0xff] }
   0x3   :  { %v15_v8 = vld [vmem:[%s391_s0] sm:$0xff]  ;;  %v353_v9 = vand.u32 4294901760, %v17_v6  ;;  %v30_v10 = vsel %vm25_vm0, %v16_v7, 0 }
   0x4   :  { %v27_v11 = vsel %vm25_vm0, %v15_v8, 0  ;;  %268 = vmatpush.msra.mxu2 %v338_v3  ;;  %v82_v12 = vsub.f32 %v20_v0, %v338_v3  ;;  %v359_v13 = vand.u32 4294901760, %v30_v10  ;;  %v88_v14 = vsub.f32 %v19_v1, %v340_v4  ;;  %45 = vmatpush.msra.mxu0 %v338_v3 }
   0x5   :  { %v94_v15 = vsub.f32 %v18_v2, %v342_v5 }
   0x6   :  { %8 = vsyncpa [#allocation3], 0  ;;  %v100_v16 = vsub.f32 %v17_v6, %v353_v9  ;;  %v52_v17 = vand.u32 4294901760, %v27_v11  ;;  %269 = vmatpush.msra.mxu2 %v340_v4  ;;  %v83_v18 = vand.u32 4294901760, %v82_v12  ;;  %v61_v19 = vsub.f32 %v30_v10, %v359_v13  ;;  %47 = vmatpush.msra.mxu0 %v340_v4  ;;  %v279_v39 = vld [vmem:[%s393_s2] ss:$0 sm:$0xff] }
   0x7   :  { %v89_v20 = vand.u32 4294901760, %v88_v14  ;;  %v95_v21 = vand.u32 4294901760, %v94_v15  ;;  %s306_s2 = smov [#allocation2]   ;;  %s256_s27 = sshll.u32 %s394_s3, 4  ;;  %s257_s27 = int_to_ptr.hbm [resolvable:$true] %s256_s27 }
   0x8   :  { %v101_v22 = vand.u32 4294901760, %v100_v16  ;;  %v53_v23 = vsub.f32 %v27_v11, %v52_v17  ;;  %270 = vmatpush.msra.mxu2 %v342_v5  ;;  %v84_v24 = vsub.f32 %v82_v12, %v83_v18  ;;  %v62_v25 = vand.u32 4294901760, %v61_v19  ;;  %49 = vmatpush.msra.mxu0 %v342_v5  ;;  %s254_s24 = sshll.u32 %s306_s2, 4  ;;  %s307_s28 = smov 128   ;;  %s255_s24 = int_to_ptr.vmem [resolvable:$true] %s254_s24 }
   0x9   :  { %v90_v26 = vsub.f32 %v88_v14, %v89_v20  ;;  %v96_v27 = vsub.f32 %v94_v15, %v95_v21  ;;  %s308_s29 = smov 8  }
   0xa   :  { %v54_v28 = vand.u32 4294901760, %v53_v23  ;;  %271 = vmatpush.msra.mxu2 %v353_v9  ;;  %v85_v29 = vand.u32 4294901760, %v84_v24  ;;  %v63_v30 = vsub.f32 %v61_v19, %v62_v25  ;;  %v102_v32 = vsub.f32 %v100_v16, %v101_v22  ;;  %51 = vmatpush.msra.mxu0 %v353_v9 }
   0xb   :  { %v91_v31 = vand.u32 4294901760, %v90_v26  ;;  %v97_v35 = vand.u32 4294901760, %v96_v27 }
   0xc   :  { %128 = vmatpush.msrb.mxu2 %v82_v12  ;;  %v55_v33 = vsub.f32 %v53_v23, %v54_v28  ;;  %197 = vmatpush.msrb.mxu0 %v83_v18  ;;  %v64_v34 = vand.u32 4294901760, %v63_v30  ;;  %v103_v37 = vand.u32 4294901760, %v102_v32 }
   0xd   :  { %272 = vmatpush.msra.mxu3 %v85_v29  ;;  %86 = vmatpush.msra.mxu1 %v85_v29 }
   0xe   :  { %131 = vmatpush.msrb.mxu2 %v88_v14  ;;  %v56_v36 = vand.u32 4294901760, %v55_v33  ;;  %201 = vmatpush.msrb.mxu0 %v89_v20 }
   0xf   :  { %65 = vmatmul.f32.vlgmr.msra.gmra.mxu2 %v64_v34  ;;  %273 = vmatpush.msra.mxu3 %v91_v31 }
  0x10   :  { %134 = vmatpush.msrb.mxu2 %v94_v15  ;;  %92 = vmatpush.msra.mxu1 %v91_v31 }
  0x11   :  { %274 = vmatpush.msra.mxu3 %v97_v35  ;;  %57 = vmatmul.f32.vlgmr.msra.gmra.mxu0 %v56_v36 }
  0x12   :  { %137 = vmatpush.msrb.mxu2 %v100_v16  ;;  %98 = vmatpush.msra.mxu1 %v97_v35 }
  0x13   :  { %275 = vmatpush.msra.mxu3 %v103_v37  ;;  %205 = vmatpush.msrb.mxu0 %v95_v21 }
  0x14   :  { %110 = vmatmul.f32.vlgmr.msra.gmra.mxu3 %v359_v13  ;;  %104 = vmatpush.msra.mxu1 %v103_v37 }
  0x15   :  { %162 = vmatpush.msrb.mxu3 %v338_v3  ;;  %106 = vmatmul.f32.vlgmr.msra.gmra.mxu1 %v52_v17 }
  0x16   :  { %232 = vmatpush.msrb.mxu1 %v338_v3  ;;  %209 = vmatpush.msrb.mxu0 %v101_v22 }
  0x17   :  { %140 = vmatmul.f32.vlgmr.msrb.gmra.mxu2 %v53_v23  ;;  %164 = vmatpush.msrb.mxu3 %v340_v4 }
  0x18   :  { %234 = vmatpush.msrb.mxu1 %v340_v4 }
  0x19   :  { %166 = vmatpush.msrb.mxu3 %v342_v5  ;;  %211 = vmatmul.f32.vlgmr.msrb.gmra.mxu0 %v52_v17 }
  0x1a   :  { %236 = vmatpush.msrb.mxu1 %v342_v5 }
  0x1b   :  { %168 = vmatpush.msrb.mxu3 %v353_v9 }
  0x1c   :  { %172 = vmatmul.f32.vlgmr.msrb.gmra.mxu3 %v54_v28  ;;  %238 = vmatpush.msrb.mxu1 %v353_v9 }
  0x1d   :  { %240 = vmatmul.f32.vlgmr.msrb.gmra.mxu1 %v52_v17 }
  0x1f   :  { %145 = vmatmul.f32.gmra.mxu2 %v61_v19 }
  0x21   :  { %215 = vmatmul.f32.gmra.mxu0 %v359_v13 }
  0x24   :  { %178 = vmatmul.f32.gmra.mxu3 %v62_v25 }
  0x25   :  { %244 = vmatmul.f32.gmra.mxu1 %v359_v13 }
  0x8e   :  { %v58_v38 = vpop.f32.mrf.mxu0 }
  0x8f   :  { %v59_v41 = vadd.f32 %v279_v39, %v58_v38 }
  0x92   :  { %v66_v40 = vpop.f32.mrf.mxu2  ;;  %v107_v42 = vpop.f32.mrf.mxu1 }
  0x93   :  { %v108_v44 = vadd.f32 %v107_v42, %v59_v41  ;;  %v67_v50 = vadd.f32 %v279_v39, %v66_v40 }
  0x96   :  { %v212_v47 = vpop.f32.mrf.mxu0 }
  0x97   :  { %v111_v43 = vpop.f32.mrf.mxu3 }
  0x98   :  { %v112_v54 = vadd.f32 %v111_v43, %v67_v50 }
  0x9a   :  { %v141_v45 = vpop.f32.mrf.mxu2  ;;  %v241_v49 = vpop.f32.mrf.mxu1 }
  0x9b   :  { %v142_v46 = vadd.f32 %v141_v45, %v108_v44 }
  0x9e   :  { %v216_v58 = vpop.f32.mrf.mxu0 }
  0x9f   :  { %v173_v48 = vpop.f32.mrf.mxu3 }
  0xa0   :  { %v174_v51 = vadd.f32 %v173_v48, %v142_v46 }
  0xa2   :  { %v213_v52 = vadd.f32 %v212_v47, %v174_v51  ;;  %v146_v53 = vpop.f32.mrf.mxu2  ;;  %v245_v60 = vpop.f32.mrf.mxu1 }
  0xa3   :  { %v147_v56 = vadd.f32 %v146_v53, %v112_v54 }
  0xa4   :  { %v242_v55 = vadd.f32 %v241_v49, %v213_v52 }
  0xa6   :  { %248 = vst.msk [vmem:[#allocation2] sm:$0xff] %vm25_vm0, %v242_v55 }
  0xa7   :  { %v179_v57 = vpop.f32.mrf.mxu3 }
  0xa8   :  { %v180_v59 = vadd.f32 %v179_v57, %v147_v56 }
  0xaa   :  { %v217_v61 = vadd.f32 %v216_v58, %v180_v59 }
  0xac   :  { %v246_v62 = vadd.f32 %v245_v60, %v217_v61 }
  0xae   :  { %249 = vst.msk [vmem:[#allocation2 + $0x8] sm:$0xff] %vm25_vm0, %v246_v62 }
  0xaf   :  { %262 = dma.vmem_to_hbm [thread:$0]  %s255_s24, 256, %s257_s27, [#allocation3], %s307_s28, %s307_s28, %s308_s29  }
  0xb0   :  { %304 = dma.done.wait [#allocation3], 256  }
  0xb1   :  { %305 = vsyncadd [#allocation3], 4294967040 }
  0xb2   :  { %267 = vsyncpa [#allocation3], 1 }

</bundles_post_ra>
